<compile_context>
chip_gen: v7x
topology: tpu7x:2x2x1
jax: 0.10.0
libtpu: 0.0.40
codegen_flags: <defaults>
</compile_context>

<pallas_src>
import functools

import jax
import jax.numpy as jnp
from jax import lax
from jax.experimental import pallas as pl
from jax.experimental.pallas import tpu as pltpu

_LN_EPS = 1e-5


# ----------------------------------------------------------------------------
# Kernel: full Actor forward for one tile of batch rows.
# ----------------------------------------------------------------------------
def actor_kernel(
    x_ref,
    w1_ref, b1_ref, g1_ref, be1_ref,
    w2_ref, b2_ref, g2_ref, be2_ref,
    w3_ref, b3_ref, g3_ref, be3_ref,
    wh_ref, bh_ref,          # fused dist+scale head, zero-padded to lane width
    out_ref,
    *,
    action_dim: int,
    maxaction: float,
):
    def linear_relu_ln(h_bf16, w_ref, b_ref, g_ref, be_ref):
        # bf16 MXU matmul, f32 accumulation + bias.
        z = jnp.dot(h_bf16, w_ref[...], preferred_element_type=jnp.float32)
        z = jnp.maximum(z + b_ref[...], 0.0)
        # LayerNorm in f32 with the affine gamma folded into the rsqrt scale.
        mu = jnp.mean(z, axis=-1, keepdims=True)
        zm = z - mu
        var = jnp.mean(zm * zm, axis=-1, keepdims=True)
        out = zm * (g_ref[...] * lax.rsqrt(var + _LN_EPS)) + be_ref[...]
        return out.astype(jnp.bfloat16)      # next matmul input

    x = x_ref[...].astype(jnp.bfloat16)
    h = linear_relu_ln(x, w1_ref, b1_ref, g1_ref, be1_ref)
    h = linear_relu_ln(h, w2_ref, b2_ref, g2_ref, be2_ref)
    h = linear_relu_ln(h, w3_ref, b3_ref, g3_ref, be3_ref)

    # One fused head matmul (lane-dense 128-wide weight):
    #   cols [0, action_dim) -> dist logits, col action_dim -> scale pre-act.
    z = jnp.dot(h, wh_ref[...], preferred_element_type=jnp.float32) + bh_ref[...]

    logits = z[:, :action_dim]
    m = jnp.max(logits, axis=-1, keepdims=True)
    e = jnp.exp(logits - m)
    denom = jnp.sum(e, axis=-1, keepdims=True)
    dist = e / denom                          # exact: rows sum to total_power

    s = z[:, action_dim:action_dim + 1]       # static lane slice, no masked reduce
    total_power = jax.nn.sigmoid(s) * maxaction

    out_ref[...] = (dist * total_power).astype(out_ref.dtype)


# ----------------------------------------------------------------------------
# Generation-aware config & tiling helpers
# ----------------------------------------------------------------------------
def _round_up(x, m):
    return ((x + m - 1) // m) * m


def _gen_config():
    try:
        kind = jax.devices()[0].device_kind.lower()
    except Exception:  # pragma: no cover - defensive
        kind = ""
    if "v7" in kind:
        # 64 MiB physical VMEM per TC -> stay within the default scoped limit.
        return dict(tile_cap=2048, vmem_limit=32 * 1024 * 1024)
    # v5e / v6e: 128 MiB physical VMEM.
    return dict(tile_cap=4096, vmem_limit=64 * 1024 * 1024)


def _choose_tile_b(B, cap):
    """8-aligned batch tile; >= 2 grid steps whenever the batch allows it."""
    b8 = _round_up(max(int(B), 1), 8)
    if b8 >= 2 * cap:
        return cap
    if b8 >= 16:
        # Split into two roughly equal 8-aligned tiles so both v7x TCs get work.
        return _round_up((b8 + 1) // 2, 8)
    return b8


# ----------------------------------------------------------------------------
# Parameter preparation (done ONCE, outside the forward path)
# ----------------------------------------------------------------------------
def prepare_actor_params(params):
    """Fuse dist+scale heads and cast matmul weights to bf16 (one-time cost)."""
    w4_dim, action_dim = params["wd"].shape
    out_pad = pl.cdiv(action_dim + 1, 128) * 128

    wh = jnp.zeros((w4_dim, out_pad), jnp.float32)
    wh = wh.at[:, :action_dim].set(params["wd"])
    wh = wh.at[:, action_dim].set(params["ws"][:, 0])
    bh = jnp.zeros((1, out_pad), jnp.float32)
    bh = bh.at[:, :action_dim].set(params["bd"][0])
    bh = bh.at[:, action_dim].set(params["bs"][0, 0])

    return dict(
        action_dim=int(action_dim),
        w1=params["w1"].astype(jnp.bfloat16), b1=params["b1"],
        g1=params["g1"], be1=params["be1"],
        w2=params["w2"].astype(jnp.bfloat16), b2=params["b2"],
        g2=params["g2"], be2=params["be2"],
        w3=params["w3"].astype(jnp.bfloat16), b3=params["b3"],
        g3=params["g3"], be3=params["be3"],
        wh=wh.astype(jnp.bfloat16), bh=bh,
    )


# ----------------------------------------------------------------------------
# Wrapper
# ----------------------------------------------------------------------------
def actor_forward(state, prepared, maxaction, *, tile_b=None):
    B, state_dim = state.shape
    action_dim = prepared["action_dim"]
    cfg = _gen_config()

    if tile_b is None:
        tile_b = _choose_tile_b(B, cfg["tile_cap"])
    tile_b = int(tile_b)
    assert tile_b % 8 == 0 or tile_b == B, "tile_b must be a multiple of 8"

    grid = pl.cdiv(B, tile_b)
    padded_B = grid * tile_b
    x = state
    if padded_B != B:
        x = jnp.zeros((padded_B, state_dim), state.dtype).at[:B].set(state)

    weight_args = [
        prepared["w1"], prepared["b1"], prepared["g1"], prepared["be1"],
        prepared["w2"], prepared["b2"], prepared["g2"], prepared["be2"],
        prepared["w3"], prepared["b3"], prepared["g3"], prepared["be3"],
        prepared["wh"], prepared["bh"],
    ]

    def resident(shape):
        # Full-array block, constant index -> stays VMEM-resident across steps.
        return pl.BlockSpec(shape, lambda i: (0, 0))

    in_specs = [pl.BlockSpec((tile_b, state_dim), lambda i: (i, 0))] + [
        resident(p.shape) for p in weight_args
    ]

    kernel = functools.partial(
        actor_kernel, action_dim=action_dim, maxaction=float(maxaction)
    )

    out = pl.pallas_call(
        kernel,
        out_shape=jax.ShapeDtypeStruct((padded_B, action_dim), jnp.float32),
        grid_spec=pltpu.PrefetchScalarGridSpec(
            num_scalar_prefetch=0,
            grid=(grid,),
            in_specs=in_specs,
            # Narrow output block is legal: last dim == full array last dim.
            out_specs=pl.BlockSpec((tile_b, action_dim), lambda i: (i, 0)),
        ),
        compiler_params=pltpu.CompilerParams(
            dimension_semantics=("parallel",),
            vmem_limit_bytes=cfg["vmem_limit"],
        ),
    )(x, *weight_args)

    return out if padded_B == B else out[:B]


# ----------------------------------------------------------------------------
# Deterministic parameter init (mimics nn.Linear / nn.LayerNorm shapes)
# ----------------------------------------------------------------------------
def init_params(key, state_dim, action_dim, net_width):
    w2_dim = net_width // 2
    w4_dim = net_width // 4

    def linear(k, fan_in, fan_out):
        k1, k2 = jax.random.split(k)
        bound = 1.0 / jnp.sqrt(fan_in)
        w = jax.random.uniform(k1, (fan_in, fan_out), jnp.float32, -bound, bound)
        b = jax.random.uniform(k2, (1, fan_out), jnp.float32, -bound, bound)
        return w, b

    keys = jax.random.split(key, 5)
    w1, b1 = linear(keys[0], state_dim, net_width)
    w2, b2 = linear(keys[1], net_width, w2_dim)
    w3, b3 = linear(keys[2], w2_dim, w4_dim)
    wd, bd = linear(keys[3], w4_dim, action_dim)
    ws, bs = linear(keys[4], w4_dim, 1)

    return dict(
        w1=w1, b1=b1,
        g1=jnp.ones((1, net_width), jnp.float32), be1=jnp.zeros((1, net_width), jnp.float32),
        w2=w2, b2=b2,
        g2=jnp.ones((1, w2_dim), jnp.float32), be2=jnp.zeros((1, w2_dim), jnp.float32),
        w3=w3, b3=b3,
        g3=jnp.ones((1, w4_dim), jnp.float32), be3=jnp.zeros((1, w4_dim), jnp.float32),
        wd=wd, bd=bd,
        ws=ws, bs=bs,
    )


# Pure-JAX f32 reference for verification (matches the PyTorch module).
def actor_reference(state, params, maxaction):
    def block(h, w, b, g, be):
        z = jnp.maximum(h @ w + b, 0.0)
        mu = jnp.mean(z, axis=-1, keepdims=True)
        var = jnp.mean((z - mu) ** 2, axis=-1, keepdims=True)
        return (z - mu) / jnp.sqrt(var + _LN_EPS) * g + be

    h = block(state, params["w1"], params["b1"], params["g1"], params["be1"])
    h = block(h, params["w2"], params["b2"], params["g2"], params["be2"])
    h = block(h, params["w3"], params["b3"], params["g3"], params["be3"])
    logits = h @ params["wd"] + params["bd"]
    dist = jax.nn.softmax(logits, axis=-1)
    scale = jax.nn.sigmoid(h @ params["ws"] + params["bs"])[:, 0]
    total_power = scale * maxaction
    return dist * total_power[:, None]


if __name__ == "__main__":
    # Small shapes consistent with the module's forward.
    batch = 64
    state_dim = 16
    net_width = 32          # hidden widths 32 -> 16 -> 8 (spec: tiny MLP)
    action_dim = 4
    maxaction = 2.5

    key = jax.random.PRNGKey(0)
    k_state, k_params = jax.random.split(key)

    state = jax.random.normal(k_state, (batch, state_dim), dtype=jnp.float32)
    params = init_params(k_params, state_dim, action_dim, net_width)
    prepared = prepare_actor_params(params)   # one-time bf16 cast + head fusion

    ref = actor_reference(state, params, maxaction)

    # Default tiling: tile_b = 32 -> 2 grid steps (exercises megacore split).
    out_default = jax.block_until_ready(actor_forward(state, prepared, maxaction))
    # Explicit small tile: multi-step pipelined grid path.
    out_tiled = jax.block_until_ready(
        actor_forward(state, prepared, maxaction, tile_b=16))
    # Ragged batch: exercises the pad-to-tile + trailing-slice path.
    state_ragged = state[:50]
    ref_ragged = actor_reference(state_ragged, params, maxaction)
    out_ragged = jax.block_until_ready(actor_forward(state_ragged, prepared, maxaction))

    # Tolerance covers the bf16 matmul inputs (LN/softmax math is f32).
    tol = dict(atol=2e-2, rtol=2e-2)
    assert out_default.shape == (batch, action_dim)
    assert out_tiled.shape == (batch, action_dim)
    assert out_ragged.shape == (50, action_dim)
    assert jnp.allclose(out_default, ref, **tol), "default-tile mismatch vs reference"
    assert jnp.allclose(out_tiled, ref, **tol), "tiled mismatch vs reference"
    assert jnp.allclose(out_ragged, ref_ragged, **tol), "ragged-batch mismatch vs reference"

    print("KERNEL_OK")
</pallas_src>

<mosaic_0001>
module attributes {stable_mosaic.version = 11 : i64} {
  func.func @actor_kernel(%arg0: i32, %arg1: memref<32x16xf32, #tpu.memory_space<vmem>>, %arg2: memref<16x32xbf16, #tpu.memory_space<vmem>>, %arg3: memref<1x32xf32, #tpu.memory_space<vmem>>, %arg4: memref<1x32xf32, #tpu.memory_space<vmem>>, %arg5: memref<1x32xf32, #tpu.memory_space<vmem>>, %arg6: memref<32x16xbf16, #tpu.memory_space<vmem>>, %arg7: memref<1x16xf32, #tpu.memory_space<vmem>>, %arg8: memref<1x16xf32, #tpu.memory_space<vmem>>, %arg9: memref<1x16xf32, #tpu.memory_space<vmem>>, %arg10: memref<16x8xbf16, #tpu.memory_space<vmem>>, %arg11: memref<1x8xf32, #tpu.memory_space<vmem>>, %arg12: memref<1x8xf32, #tpu.memory_space<vmem>>, %arg13: memref<1x8xf32, #tpu.memory_space<vmem>>, %arg14: memref<8x128xbf16, #tpu.memory_space<vmem>>, %arg15: memref<1x128xf32, #tpu.memory_space<vmem>>, %arg16: memref<32x4xf32, #tpu.memory_space<vmem>>) attributes {dimension_semantics = [#tpu.dimension_semantics<parallel>], iteration_bounds = array<i64: 2>, scalar_prefetch = 0 : i64, scratch_operands = 0 : i64, tpu.core_type = #tpu.core_type<tc>, window_params = [{transform_indices = @transform_0, window_bounds = array<i64: 32, 16>}, {pipeline_mode = #tpu.pipeline_mode<synchronous>, transform_indices = @transform_1, window_bounds = array<i64: 16, 32>}, {pipeline_mode = #tpu.pipeline_mode<synchronous>, transform_indices = @transform_2, window_bounds = array<i64: 1, 32>}, {pipeline_mode = #tpu.pipeline_mode<synchronous>, transform_indices = @transform_3, window_bounds = array<i64: 1, 32>}, {pipeline_mode = #tpu.pipeline_mode<synchronous>, transform_indices = @transform_4, window_bounds = array<i64: 1, 32>}, {pipeline_mode = #tpu.pipeline_mode<synchronous>, transform_indices = @transform_5, window_bounds = array<i64: 32, 16>}, {pipeline_mode = #tpu.pipeline_mode<synchronous>, transform_indices = @transform_6, window_bounds = array<i64: 1, 16>}, {pipeline_mode = #tpu.pipeline_mode<synchronous>, transform_indices = @transform_7, window_bounds = array<i64: 1, 16>}, {pipeline_mode = #tpu.pipeline_mode<synchronous>, transform_indices = @transform_8, window_bounds = array<i64: 1, 16>}, {pipeline_mode = #tpu.pipeline_mode<synchronous>, transform_indices = @transform_9, window_bounds = array<i64: 16, 8>}, {pipeline_mode = #tpu.pipeline_mode<synchronous>, transform_indices = @transform_10, window_bounds = array<i64: 1, 8>}, {pipeline_mode = #tpu.pipeline_mode<synchronous>, transform_indices = @transform_11, window_bounds = array<i64: 1, 8>}, {pipeline_mode = #tpu.pipeline_mode<synchronous>, transform_indices = @transform_12, window_bounds = array<i64: 1, 8>}, {pipeline_mode = #tpu.pipeline_mode<synchronous>, transform_indices = @transform_13, window_bounds = array<i64: 8, 128>}, {pipeline_mode = #tpu.pipeline_mode<synchronous>, transform_indices = @transform_14, window_bounds = array<i64: 1, 128>}, {transform_indices = @transform_15, window_bounds = array<i64: 32, 4>}]} {
    %c0 = arith.constant 0 : index
    %c0_0 = arith.constant 0 : index
    %0 = vector.load %arg1[%c0, %c0_0] : memref<32x16xf32, #tpu.memory_space<vmem>>, vector<32x16xf32>
    %1 = arith.truncf %0 : vector<32x16xf32> to vector<32x16xbf16>
    %c0_1 = arith.constant 0 : index
    %c0_2 = arith.constant 0 : index
    %2 = vector.load %arg2[%c0_1, %c0_2] : memref<16x32xbf16, #tpu.memory_space<vmem>>, vector<16x32xbf16>
    %cst = arith.constant dense<0.000000e+00> : vector<32x32xf32>
    %3 = tpu.matmul %1, %2, %cst {dimension_numbers = #tpu.dot_dimension_numbers<[1], [0], [0], [1], [0, 0, 1, 1], [], []>} : vector<32x16xbf16>, vector<16x32xbf16>, vector<32x32xf32> -> vector<32x32xf32>
    %c0_3 = arith.constant 0 : index
    %c0_4 = arith.constant 0 : index
    %4 = vector.load %arg3[%c0_3, %c0_4] : memref<1x32xf32, #tpu.memory_space<vmem>>, vector<1x32xf32>
    %5 = vector.broadcast %4 : vector<1x32xf32> to vector<32x32xf32>
    %6 = arith.addf %3, %5 : vector<32x32xf32>
    %cst_5 = arith.constant 0.000000e+00 : f32
    %7 = vector.broadcast %cst_5 : f32 to vector<32x32xf32>
    %8 = arith.maximumf %6, %7 : vector<32x32xf32>
    %cst_6 = arith.constant dense<0.000000e+00> : vector<32xf32>
    %9 = vector.multi_reduction <add>, %8, %cst_6 [1] : vector<32x32xf32> to vector<32xf32>
    %10 = vector.shape_cast %9 : vector<32xf32> to vector<32x1xf32>
    %cst_7 = arith.constant 3.200000e+01 : f32
    %11 = vector.broadcast %cst_7 : f32 to vector<32x1xf32>
    %12 = arith.divf %10, %11 : vector<32x1xf32>
    %13 = vector.broadcast %12 : vector<32x1xf32> to vector<32x32xf32>
    %14 = arith.subf %8, %13 : vector<32x32xf32>
    %15 = arith.mulf %14, %14 : vector<32x32xf32>
    %cst_8 = arith.constant dense<0.000000e+00> : vector<32xf32>
    %16 = vector.multi_reduction <add>, %15, %cst_8 [1] : vector<32x32xf32> to vector<32xf32>
    %17 = vector.shape_cast %16 : vector<32xf32> to vector<32x1xf32>
    %cst_9 = arith.constant 3.200000e+01 : f32
    %18 = vector.broadcast %cst_9 : f32 to vector<32x1xf32>
    %19 = arith.divf %17, %18 : vector<32x1xf32>
    %c0_10 = arith.constant 0 : index
    %c0_11 = arith.constant 0 : index
    %20 = vector.load %arg4[%c0_10, %c0_11] : memref<1x32xf32, #tpu.memory_space<vmem>>, vector<1x32xf32>
    %cst_12 = arith.constant 9.99999974E-6 : f32
    %21 = vector.broadcast %cst_12 : f32 to vector<32x1xf32>
    %22 = arith.addf %19, %21 : vector<32x1xf32>
    %23 = math.rsqrt %22 : vector<32x1xf32>
    %24 = vector.broadcast %20 : vector<1x32xf32> to vector<32x32xf32>
    %25 = vector.broadcast %23 : vector<32x1xf32> to vector<32x32xf32>
    %26 = arith.mulf %24, %25 : vector<32x32xf32>
    %27 = arith.mulf %14, %26 : vector<32x32xf32>
    %c0_13 = arith.constant 0 : index
    %c0_14 = arith.constant 0 : index
    %28 = vector.load %arg5[%c0_13, %c0_14] : memref<1x32xf32, #tpu.memory_space<vmem>>, vector<1x32xf32>
    %29 = vector.broadcast %28 : vector<1x32xf32> to vector<32x32xf32>
    %30 = arith.addf %27, %29 : vector<32x32xf32>
    %31 = arith.truncf %30 : vector<32x32xf32> to vector<32x32xbf16>
    %c0_15 = arith.constant 0 : index
    %c0_16 = arith.constant 0 : index
    %32 = vector.load %arg6[%c0_15, %c0_16] : memref<32x16xbf16, #tpu.memory_space<vmem>>, vector<32x16xbf16>
    %cst_17 = arith.constant dense<0.000000e+00> : vector<32x16xf32>
    %33 = tpu.matmul %31, %32, %cst_17 {dimension_numbers = #tpu.dot_dimension_numbers<[1], [0], [0], [1], [0, 0, 1, 1], [], []>} : vector<32x32xbf16>, vector<32x16xbf16>, vector<32x16xf32> -> vector<32x16xf32>
    %c0_18 = arith.constant 0 : index
    %c0_19 = arith.constant 0 : index
    %34 = vector.load %arg7[%c0_18, %c0_19] : memref<1x16xf32, #tpu.memory_space<vmem>>, vector<1x16xf32>
    %35 = vector.broadcast %34 : vector<1x16xf32> to vector<32x16xf32>
    %36 = arith.addf %33, %35 : vector<32x16xf32>
    %cst_20 = arith.constant 0.000000e+00 : f32
    %37 = vector.broadcast %cst_20 : f32 to vector<32x16xf32>
    %38 = arith.maximumf %36, %37 : vector<32x16xf32>
    %cst_21 = arith.constant dense<0.000000e+00> : vector<32xf32>
    %39 = vector.multi_reduction <add>, %38, %cst_21 [1] : vector<32x16xf32> to vector<32xf32>
    %40 = vector.shape_cast %39 : vector<32xf32> to vector<32x1xf32>
    %cst_22 = arith.constant 1.600000e+01 : f32
    %41 = vector.broadcast %cst_22 : f32 to vector<32x1xf32>
    %42 = arith.divf %40, %41 : vector<32x1xf32>
    %43 = vector.broadcast %42 : vector<32x1xf32> to vector<32x16xf32>
    %44 = arith.subf %38, %43 : vector<32x16xf32>
    %45 = arith.mulf %44, %44 : vector<32x16xf32>
    %cst_23 = arith.constant dense<0.000000e+00> : vector<32xf32>
    %46 = vector.multi_reduction <add>, %45, %cst_23 [1] : vector<32x16xf32> to vector<32xf32>
    %47 = vector.shape_cast %46 : vector<32xf32> to vector<32x1xf32>
    %cst_24 = arith.constant 1.600000e+01 : f32
    %48 = vector.broadcast %cst_24 : f32 to vector<32x1xf32>
    %49 = arith.divf %47, %48 : vector<32x1xf32>
    %c0_25 = arith.constant 0 : index
    %c0_26 = arith.constant 0 : index
    %50 = vector.load %arg8[%c0_25, %c0_26] : memref<1x16xf32, #tpu.memory_space<vmem>>, vector<1x16xf32>
    %cst_27 = arith.constant 9.99999974E-6 : f32
    %51 = vector.broadcast %cst_27 : f32 to vector<32x1xf32>
    %52 = arith.addf %49, %51 : vector<32x1xf32>
    %53 = math.rsqrt %52 : vector<32x1xf32>
    %54 = vector.broadcast %50 : vector<1x16xf32> to vector<32x16xf32>
    %55 = vector.broadcast %53 : vector<32x1xf32> to vector<32x16xf32>
    %56 = arith.mulf %54, %55 : vector<32x16xf32>
    %57 = arith.mulf %44, %56 : vector<32x16xf32>
    %c0_28 = arith.constant 0 : index
    %c0_29 = arith.constant 0 : index
    %58 = vector.load %arg9[%c0_28, %c0_29] : memref<1x16xf32, #tpu.memory_space<vmem>>, vector<1x16xf32>
    %59 = vector.broadcast %58 : vector<1x16xf32> to vector<32x16xf32>
    %60 = arith.addf %57, %59 : vector<32x16xf32>
    %61 = arith.truncf %60 : vector<32x16xf32> to vector<32x16xbf16>
    %c0_30 = arith.constant 0 : index
    %c0_31 = arith.constant 0 : index
    %62 = vector.load %arg10[%c0_30, %c0_31] : memref<16x8xbf16, #tpu.memory_space<vmem>>, vector<16x8xbf16>
    %cst_32 = arith.constant dense<0.000000e+00> : vector<32x8xf32>
    %63 = tpu.matmul %61, %62, %cst_32 {dimension_numbers = #tpu.dot_dimension_numbers<[1], [0], [0], [1], [0, 0, 1, 1], [], []>} : vector<32x16xbf16>, vector<16x8xbf16>, vector<32x8xf32> -> vector<32x8xf32>
    %c0_33 = arith.constant 0 : index
    %c0_34 = arith.constant 0 : index
    %64 = vector.load %arg11[%c0_33, %c0_34] : memref<1x8xf32, #tpu.memory_space<vmem>>, vector<1x8xf32>
    %65 = vector.broadcast %64 : vector<1x8xf32> to vector<32x8xf32>
    %66 = arith.addf %63, %65 : vector<32x8xf32>
    %cst_35 = arith.constant 0.000000e+00 : f32
    %67 = vector.broadcast %cst_35 : f32 to vector<32x8xf32>
    %68 = arith.maximumf %66, %67 : vector<32x8xf32>
    %cst_36 = arith.constant dense<0.000000e+00> : vector<32xf32>
    %69 = vector.multi_reduction <add>, %68, %cst_36 [1] : vector<32x8xf32> to vector<32xf32>
    %70 = vector.shape_cast %69 : vector<32xf32> to vector<32x1xf32>
    %cst_37 = arith.constant 8.000000e+00 : f32
    %71 = vector.broadcast %cst_37 : f32 to vector<32x1xf32>
    %72 = arith.divf %70, %71 : vector<32x1xf32>
    %73 = vector.broadcast %72 : vector<32x1xf32> to vector<32x8xf32>
    %74 = arith.subf %68, %73 : vector<32x8xf32>
    %75 = arith.mulf %74, %74 : vector<32x8xf32>
    %cst_38 = arith.constant dense<0.000000e+00> : vector<32xf32>
    %76 = vector.multi_reduction <add>, %75, %cst_38 [1] : vector<32x8xf32> to vector<32xf32>
    %77 = vector.shape_cast %76 : vector<32xf32> to vector<32x1xf32>
    %cst_39 = arith.constant 8.000000e+00 : f32
    %78 = vector.broadcast %cst_39 : f32 to vector<32x1xf32>
    %79 = arith.divf %77, %78 : vector<32x1xf32>
    %c0_40 = arith.constant 0 : index
    %c0_41 = arith.constant 0 : index
    %80 = vector.load %arg12[%c0_40, %c0_41] : memref<1x8xf32, #tpu.memory_space<vmem>>, vector<1x8xf32>
    %cst_42 = arith.constant 9.99999974E-6 : f32
    %81 = vector.broadcast %cst_42 : f32 to vector<32x1xf32>
    %82 = arith.addf %79, %81 : vector<32x1xf32>
    %83 = math.rsqrt %82 : vector<32x1xf32>
    %84 = vector.broadcast %80 : vector<1x8xf32> to vector<32x8xf32>
    %85 = vector.broadcast %83 : vector<32x1xf32> to vector<32x8xf32>
    %86 = arith.mulf %84, %85 : vector<32x8xf32>
    %87 = arith.mulf %74, %86 : vector<32x8xf32>
    %c0_43 = arith.constant 0 : index
    %c0_44 = arith.constant 0 : index
    %88 = vector.load %arg13[%c0_43, %c0_44] : memref<1x8xf32, #tpu.memory_space<vmem>>, vector<1x8xf32>
    %89 = vector.broadcast %88 : vector<1x8xf32> to vector<32x8xf32>
    %90 = arith.addf %87, %89 : vector<32x8xf32>
    %91 = arith.truncf %90 : vector<32x8xf32> to vector<32x8xbf16>
    %c0_45 = arith.constant 0 : index
    %c0_46 = arith.constant 0 : index
    %92 = vector.load %arg14[%c0_45, %c0_46] : memref<8x128xbf16, #tpu.memory_space<vmem>>, vector<8x128xbf16>
    %cst_47 = arith.constant dense<0.000000e+00> : vector<32x128xf32>
    %93 = tpu.matmul %91, %92, %cst_47 {dimension_numbers = #tpu.dot_dimension_numbers<[1], [0], [0], [1], [0, 0, 1, 1], [], []>} : vector<32x8xbf16>, vector<8x128xbf16>, vector<32x128xf32> -> vector<32x128xf32>
    %c0_48 = arith.constant 0 : index
    %c0_49 = arith.constant 0 : index
    %94 = vector.load %arg15[%c0_48, %c0_49] : memref<1x128xf32, #tpu.memory_space<vmem>>, vector<1x128xf32>
    %95 = vector.broadcast %94 : vector<1x128xf32> to vector<32x128xf32>
    %96 = arith.addf %93, %95 : vector<32x128xf32>
    %97 = vector.extract_strided_slice %96 {offsets = [0, 0], sizes = [32, 4], strides = [1, 1]} : vector<32x128xf32> to vector<32x4xf32>
    %cst_50 = arith.constant dense<0xFF800000> : vector<32xf32>
    %98 = vector.multi_reduction <maximumf>, %97, %cst_50 [1] : vector<32x4xf32> to vector<32xf32>
    %99 = vector.shape_cast %98 : vector<32xf32> to vector<32x1xf32>
    %100 = vector.broadcast %99 : vector<32x1xf32> to vector<32x4xf32>
    %101 = arith.subf %97, %100 : vector<32x4xf32>
    %102 = math.exp %101 : vector<32x4xf32>
    %cst_51 = arith.constant dense<0.000000e+00> : vector<32xf32>
    %103 = vector.multi_reduction <add>, %102, %cst_51 [1] : vector<32x4xf32> to vector<32xf32>
    %104 = vector.shape_cast %103 : vector<32xf32> to vector<32x1xf32>
    %105 = vector.broadcast %104 : vector<32x1xf32> to vector<32x4xf32>
    %106 = arith.divf %102, %105 : vector<32x4xf32>
    %107 = vector.extract_strided_slice %96 {offsets = [0, 4], sizes = [32, 1], strides = [1, 1]} : vector<32x128xf32> to vector<32x1xf32>
    %108 = arith.negf %107 : vector<32x1xf32>
    %109 = math.exp %108 : vector<32x1xf32>
    %cst_52 = arith.constant 1.000000e+00 : f32
    %110 = vector.broadcast %cst_52 : f32 to vector<32x1xf32>
    %111 = arith.addf %110, %109 : vector<32x1xf32>
    %112 = arith.divf %110, %111 : vector<32x1xf32>
    %cst_53 = arith.constant 2.500000e+00 : f32
    %113 = vector.broadcast %cst_53 : f32 to vector<32x1xf32>
    %114 = arith.mulf %112, %113 : vector<32x1xf32>
    %115 = vector.broadcast %114 : vector<32x1xf32> to vector<32x4xf32>
    %116 = arith.mulf %106, %115 : vector<32x4xf32>
    %c0_54 = arith.constant 0 : index
    %c0_55 = arith.constant 0 : index
    %117 = vector.load %arg16[%c0_54, %c0_55] : memref<32x4xf32, #tpu.memory_space<vmem>>, vector<32x4xf32>
    tpu.vector_store %arg16[%c0_54, %c0_55], %116 {strides = array<i32>} : memref<32x4xf32, #tpu.memory_space<vmem>>, vector<32x4xf32>,
    return
  }
  func.func @transform_0(%arg0: i32) -> (i32, i32) {
    %c0_i32 = arith.constant 0 : i32
    %c0_i32_0 = arith.constant 0 : i32
    return %arg0, %c0_i32 : i32, i32
  }
  func.func @transform_1(%arg0: i32) -> (i32, i32) {
    %c0_i32 = arith.constant 0 : i32
    %c0_i32_0 = arith.constant 0 : i32
    %c0_i32_1 = arith.constant 0 : i32
    return %c0_i32, %c0_i32_0 : i32, i32
  }
  func.func @transform_2(%arg0: i32) -> (i32, i32) {
    %c0_i32 = arith.constant 0 : i32
    %c0_i32_0 = arith.constant 0 : i32
    %c0_i32_1 = arith.constant 0 : i32
    return %c0_i32, %c0_i32_0 : i32, i32
  }
  func.func @transform_3(%arg0: i32) -> (i32, i32) {
    %c0_i32 = arith.constant 0 : i32
    %c0_i32_0 = arith.constant 0 : i32
    %c0_i32_1 = arith.constant 0 : i32
    return %c0_i32, %c0_i32_0 : i32, i32
  }
  func.func @transform_4(%arg0: i32) -> (i32, i32) {
    %c0_i32 = arith.constant 0 : i32
    %c0_i32_0 = arith.constant 0 : i32
    %c0_i32_1 = arith.constant 0 : i32
    return %c0_i32, %c0_i32_0 : i32, i32
  }
  func.func @transform_5(%arg0: i32) -> (i32, i32) {
    %c0_i32 = arith.constant 0 : i32
    %c0_i32_0 = arith.constant 0 : i32
    %c0_i32_1 = arith.constant 0 : i32
    return %c0_i32, %c0_i32_0 : i32, i32
  }
  func.func @transform_6(%arg0: i32) -> (i32, i32) {
    %c0_i32 = arith.constant 0 : i32
    %c0_i32_0 = arith.constant 0 : i32
    %c0_i32_1 = arith.constant 0 : i32
    return %c0_i32, %c0_i32_0 : i32, i32
  }
  func.func @transform_7(%arg0: i32) -> (i32, i32) {
    %c0_i32 = arith.constant 0 : i32
    %c0_i32_0 = arith.constant 0 : i32
    %c0_i32_1 = arith.constant 0 : i32
    return %c0_i32, %c0_i32_0 : i32, i32
  }
  func.func @transform_8(%arg0: i32) -> (i32, i32) {
    %c0_i32 = arith.constant 0 : i32
    %c0_i32_0 = arith.constant 0 : i32
    %c0_i32_1 = arith.constant 0 : i32
    return %c0_i32, %c0_i32_0 : i32, i32
  }
  func.func @transform_9(%arg0: i32) -> (i32, i32) {
    %c0_i32 = arith.constant 0 : i32
    %c0_i32_0 = arith.constant 0 : i32
    %c0_i32_1 = arith.constant 0 : i32
    return %c0_i32, %c0_i32_0 : i32, i32
  }
  func.func @transform_10(%arg0: i32) -> (i32, i32) {
    %c0_i32 = arith.constant 0 : i32
    %c0_i32_0 = arith.constant 0 : i32
    %c0_i32_1 = arith.constant 0 : i32
    return %c0_i32, %c0_i32_0 : i32, i32
  }
  func.func @transform_11(%arg0: i32) -> (i32, i32) {
    %c0_i32 = arith.constant 0 : i32
    %c0_i32_0 = arith.constant 0 : i32
    %c0_i32_1 = arith.constant 0 : i32
    return %c0_i32, %c0_i32_0 : i32, i32
  }
  func.func @transform_12(%arg0: i32) -> (i32, i32) {
    %c0_i32 = arith.constant 0 : i32
    %c0_i32_0 = arith.constant 0 : i32
    %c0_i32_1 = arith.constant 0 : i32
    return %c0_i32, %c0_i32_0 : i32, i32
  }
  func.func @transform_13(%arg0: i32) -> (i32, i32) {
    %c0_i32 = arith.constant 0 : i32
    %c0_i32_0 = arith.constant 0 : i32
    %c0_i32_1 = arith.constant 0 : i32
    return %c0_i32, %c0_i32_0 : i32, i32
  }
  func.func @transform_14(%arg0: i32) -> (i32, i32) {
    %c0_i32 = arith.constant 0 : i32
    %c0_i32_0 = arith.constant 0 : i32
    %c0_i32_1 = arith.constant 0 : i32
    return %c0_i32, %c0_i32_0 : i32, i32
  }
  func.func @transform_15(%arg0: i32) -> (i32, i32) {
    %c0_i32 = arith.constant 0 : i32
    %c0_i32_0 = arith.constant 0 : i32
    return %arg0, %c0_i32 : i32, i32
  }
}

</mosaic_0001>

<bundles_post_ra>
// kernel: tpu_custom_call.1
= control target key start
LH: loop header
LB: loop body
LE: loop exit
PB: predicated region body
PF: predicated region fallthrough
CT: control target
= control target key end

     0   :  { %s3085_s0 = inlined_call_operand.hbm [shape: f32[64,16], index: 0, kind: input, shape index: {}]   ;;  %s3086_s1 = inlined_call_operand.hbm [shape: bf16[16,32], index: 1, kind: input, shape index: {}]   ;;  %s3087_s2 = inlined_call_operand.hbm [shape: f32[1,32], index: 2, kind: input, shape index: {}]   ;;  %s3088_s3 = inlined_call_operand.hbm [shape: f32[1,32], index: 3, kind: input, shape index: {}]   ;;  %s3089_s4 = inlined_call_operand.hbm [shape: f32[1,32], index: 4, kind: input, shape index: {}]   ;;  %s3090_s5 = inlined_call_operand.hbm [shape: bf16[32,16], index: 5, kind: input, shape index: {}]   ;;  %s3091_s6 = inlined_call_operand.hbm [shape: f32[1,16], index: 6, kind: input, shape index: {}]   ;;  %s3092_s7 = inlined_call_operand.hbm [shape: f32[1,16], index: 7, kind: input, shape index: {}]   ;;  %s3093_s8 = inlined_call_operand.hbm [shape: f32[1,16], index: 8, kind: input, shape index: {}]   ;;  %s3094_s9 = inlined_call_operand.hbm [shape: bf16[16,8], index: 9, kind: input, shape index: {}]   ;;  %s3095_s10 = inlined_call_operand.hbm [shape: f32[1,8], index: 10, kind: input, shape index: {}]   ;;  %s3096_s11 = inlined_call_operand.hbm [shape: f32[1,8], index: 11, kind: input, shape index: {}]   ;;  %s3097_s12 = inlined_call_operand.hbm [shape: f32[1,8], index: 12, kind: input, shape index: {}]   ;;  %s3098_s13 = inlined_call_operand.hbm [shape: bf16[8,128], index: 13, kind: input, shape index: {}]   ;;  %s3099_s14 = inlined_call_operand.hbm [shape: f32[1,128], index: 14, kind: input, shape index: {}]   ;;  %s3100_s15 = inlined_call_operand.hbm [shape: f32[64,4], index: 15, kind: output, shape index: {}]  }
   0x1   :  { %3112 = sst [smem:[#allocation41_spill]] %s3085_s0 }
   0x2   :  { %3113 = sst [smem:[#allocation42_spill]] %s3086_s1 }
   0x3   :  { %3114 = sst [smem:[#allocation43_spill]] %s3087_s2 }
   0x4   :  { %3115 = sst [smem:[#allocation44_spill]] %s3100_s15 }
   0x5   :  { %20 = vsyncpa [#allocation3], 0 }
   0x6   :  { %22 = vsyncpa [#allocation3 + $0x1], 0 }
   0x7   :  { %23 = vsyncpa [#allocation6], 0 }
   0x8   :  { %24 = vsyncpa [#allocation9], 0 }
   0x9   :  { %25 = vsyncpa [#allocation12], 0 }
   0xa   :  { %26 = vsyncpa [#allocation15], 0 }
   0xb   :  { %27 = vsyncpa [#allocation18], 0 }
   0xc   :  { %28 = vsyncpa [#allocation21], 0 }
   0xd   :  { %29 = vsyncpa [#allocation24], 0 }
   0xe   :  { %30 = vsyncpa [#allocation4], 0 }
   0xf   :  { %32 = vsyncpa [#allocation4 + $0x1], 0  ;;  %s2542_s18 = smov 0   ;;  %s2544_s19 = smov 0  }
  0x10   :  { %s2546_s20 = smov 0   ;;  %s2548_s21 = smov 0  }
  0x11 LB: > { %3116 = sst [smem:[#allocation36_spill]] %s2425_s18  ;;  %s2439_s22 = smov [#allocation5]   ;;  %s2437_s21 = sphi %s2548_s21, %s3164_s21   ;;  %s2433_s20 = sphi %s2546_s20, %s3163_s20   ;;  %s2429_s19 = sphi %s2544_s19, %s3162_s19   ;;  %s2425_s18 = sphi %s2542_s18, %s3161_s18  }
  0x12   : > { %3117 = sst [smem:[#allocation37_spill]] %s2429_s19  ;;  %s401_s23 = sshll.u32 %s2439_s22, 4  ;;  %s2568_s23 = int_to_ptr.vmem [resolvable:$true] %s401_s23 }
  0x13   : > { %3118 = sst [smem:[#allocation38_spill]] %s2433_s20  ;;  %s2563_s24 = sadd.s32 4294967295, %s2437_s21  }
  0x14   : > { %3119 = sst [smem:[#allocation39_spill]] %s2563_s24  ;;  %p1556_p0 = scmp.ge.s32.totalorder %s2437_s21, 1 }
  0x15   : > { %p3109_p1 = scmp.eq.s32.totalorder %s2563_s24, 0  ;;  %p389_p2 = scmp.lt.s32.totalorder %s2437_s21, 3 }
  0x16   : > { %s2440_s26 = smov [#allocation8]   ;;  %s2441_s29 = smov [#allocation11]  }
  0x17   : > { %p2570_p3 = pnand %p1556_p0, %p389_p2  ;;  %s426_s27 = sshll.u32 %s2440_s26, 4  ;;  %s2583_s27 = int_to_ptr.vmem [resolvable:$true] %s426_s27 }
  0x18   : > { %s447_s30 = sshll.u32 %s2441_s29, 4  ;;  %s3123_s1 = sld [smem:[#allocation42_spill]]  ;;  %s2585_s30 = int_to_ptr.vmem [resolvable:$true] %s447_s30 }
  0x19   : > { %s3120_s25 = scalar_select %p2570_p3, 1, 0 }
  0x1a   : > { %p1725_p5 = pneg %p2570_p3 }
  0x1b   : > { %3121 = sst [smem:[#allocation40_spill]] %s3120_s25 }
  0x1c   : > { %p2579_p6 = pnand %p1725_p5, %p3109_p1 }
  0x1e   : > { %s1921_s22 = scalar_lea.hbm %s3123_s1, 128  ;;  %p2595_p8 = pneg %p2579_p6 }
  0x1f   : > { %p1922_p7 = scmp.ne.s32.totalorder %s3123_s1, %s1921_s22  ;;  %p1928_p11 = scmp.lt.u32.totalorder %s1921_s22, %s3123_s1 }
  0x21   : > { %p1924_p9 = pnand %p2595_p8, %p1922_p7 }
  0x23   : > { %p1925_p10 = pneg %p1924_p9 }
  0x25   : > { %p1930_p12 = pnand %p1928_p11, %p1925_p10 }
  0x27   : > { %1933 = shalt.err (!%p1930_p12)
}
  0x28   : > { %s1934_s15 = scalar_lea.vmem %s2568_s23, 128  ;;  %p1942_p5 = scmp.lt.s32.totalorder %s2568_s23, %s2568_s23 }
  0x29   : > { %p1935_p13 = scmp.ne.s32.totalorder %s2568_s23, %s1934_s15  ;;  %p1943_p4 = scmp.lt.s32.totalorder %s1934_s15, %s1934_s15 }
  0x2b   : > { %p1937_p0 = pnand %p1935_p13, %p2595_p8  ;;  %p1944_p7 = por %p1943_p4, %p1942_p5 }
  0x2d   : > { %p1938_p2 = pneg %p1937_p0 }
  0x2f   : > { %p1945_p9 = pnand %p1944_p7, %p1938_p2 }
  0x31   : > { %1948 = shalt.err (!%p1945_p9)
}
  0x32   : > { %s2442_s25 = smov 64   ;;  %s2443_s0 = smov 4  }
  0x33   : > { %1728 = dma.hbm_to_vmem [thread:$0]  (!%p2579_p6), %s3123_s1, 128, %s2568_s23, [#allocation6], %s2442_s25, %s2442_s25, %s2443_s0  }
  0x34   : > { %s1949_s15 = scalar_lea.hbm %s3088_s3, 16 }
  0x35   : > { %p1950_p4 = scmp.ne.s32.totalorder %s3088_s3, %s1949_s15  ;;  %p1956_p12 = scmp.lt.u32.totalorder %s1949_s15, %s3088_s3 }
  0x37   : > { %p1952_p10 = pnand %p1950_p4, %p2595_p8 }
  0x39   : > { %p1953_p11 = pneg %p1952_p10 }
  0x3b   : > { %p1958_p13 = pnand %p1956_p12, %p1953_p11 }
  0x3d   : > { %1961 = shalt.err (!%p1958_p13)
}
  0x3e   : > { %s1962_s23 = scalar_lea.vmem %s2583_s27, 16  ;;  %s1969_s18 = scalar_lea.vmem %s2583_s27, 32 }
  0x3f   : > { %p1963_p0 = scmp.ne.s32.totalorder %s2583_s27, %s1962_s23  ;;  %p1970_p7 = scmp.lt.s32.totalorder %s2583_s27, %s2583_s27 }
  0x40   : > { %p1971_p9 = scmp.lt.s32.totalorder %s1969_s18, %s1962_s23 }
  0x41   : > { %p1965_p2 = pnand %p1963_p0, %p2595_p8 }
  0x42   : > { %p1972_p4 = por %p1971_p9, %p1970_p7 }
  0x43   : > { %p1966_p5 = pneg %p1965_p2 }
  0x45   : > { %p1973_p10 = pnand %p1972_p4, %p1966_p5 }
  0x47   : > { %1976 = shalt.err (!%p1973_p10)
}
  0x48   : > { %1734 = dma.hbm_to_vmem [thread:$0]  (!%p2579_p6), %s3088_s3, 16, %s2583_s27, [#allocation9]  }
  0x49   : > { %s1977_s17 = scalar_lea.hbm %s3090_s5, 256 }
  0x4a   : > { %p1978_p11 = scmp.ne.s32.totalorder %s3090_s5, %s1977_s17  ;;  %p1984_p0 = scmp.lt.u32.totalorder %s1977_s17, %s3090_s5 }
  0x4c   : > { %p1980_p12 = pnand %p1978_p11, %p2595_p8 }
  0x4e   : > { %p1981_p13 = pneg %p1980_p12 }
  0x50   : > { %p1986_p2 = pnand %p1984_p0, %p1981_p13 }
  0x52   : > { %1989 = shalt.err (!%p1986_p2)
}
  0x53   : > { %s1990_s27 = scalar_lea.vmem %s2585_s30, 256  ;;  %p1998_p4 = scmp.lt.s32.totalorder %s2585_s30, %s2585_s30 }
  0x54   : > { %p1991_p5 = scmp.ne.s32.totalorder %s2585_s30, %s1990_s27  ;;  %p1999_p10 = scmp.lt.s32.totalorder %s1990_s27, %s1990_s27 }
  0x56   : > { %p1993_p7 = pnand %p1991_p5, %p2595_p8  ;;  %p2000_p11 = por %p1999_p10, %p1998_p4 }
  0x58   : > { %p1994_p9 = pneg %p1993_p7 }
  0x5a   : > { %p2001_p12 = pnand %p2000_p11, %p1994_p9 }
  0x5c   : > { %2004 = shalt.err (!%p2001_p12)
}
  0x5d   : > { %1740 = dma.hbm_to_vmem [thread:$0]  (!%p2579_p6), %s3090_s5, 256, %s2585_s30, [#allocation12], %s2442_s25, %s2442_s25, %s2443_s0  }
  0x5e   : > { %s2444_s20 = smov [#allocation14]   ;;  %s2445_s16 = smov [#allocation17]  }
  0x5f   : > { %s472_s24 = sshll.u32 %s2444_s20, 4  ;;  %s493_s17 = sshll.u32 %s2445_s16, 4  ;;  %s473_s24 = int_to_ptr.vmem [resolvable:$true] %s472_s24  ;;  %s494_s17 = int_to_ptr.vmem [resolvable:$true] %s493_s17 }
  0x60   : > { %s2005_s15 = scalar_lea.hbm %s3092_s7, 16 }
  0x61   : > { %p2006_p13 = scmp.ne.s32.totalorder %s3092_s7, %s2005_s15  ;;  %p2012_p5 = scmp.lt.u32.totalorder %s2005_s15, %s3092_s7 }
  0x63   : > { %p2008_p0 = pnand %p2006_p13, %p2595_p8 }
  0x65   : > { %p2009_p2 = pneg %p2008_p0 }
  0x67   : > { %p2014_p7 = pnand %p2012_p5, %p2009_p2 }
  0x69   : > { %2017 = shalt.err (!%p2014_p7)
}
  0x6a   : > { %s2018_s30 = scalar_lea.vmem %s473_s24, 16  ;;  %s2025_s19 = scalar_lea.vmem %s473_s24, 32 }
  0x6b   : > { %p2019_p9 = scmp.ne.s32.totalorder %s473_s24, %s2018_s30  ;;  %p2026_p11 = scmp.lt.s32.totalorder %s473_s24, %s473_s24 }
  0x6c   : > { %p2027_p12 = scmp.lt.s32.totalorder %s2025_s19, %s2018_s30 }
  0x6d   : > { %p2021_p4 = pnand %p2019_p9, %p2595_p8 }
  0x6e   : > { %p2028_p1 = por %p2027_p12, %p2026_p11 }
  0x6f   : > { %p2022_p10 = pneg %p2021_p4 }
  0x71   : > { %p2029_p3 = pnand %p2028_p1, %p2022_p10 }
  0x73   : > { %2032 = shalt.err (!%p2029_p3)
}
  0x74   : > { %1746 = dma.hbm_to_vmem [thread:$0]  (!%p2579_p6), %s3092_s7, 16, %s473_s24, [#allocation15]  }
  0x75   : > { %s2033_s29 = scalar_lea.hbm %s3094_s9, 128 }
  0x76   : > { %p2034_p13 = scmp.ne.s32.totalorder %s3094_s9, %s2033_s29  ;;  %p2040_p3 = scmp.lt.u32.totalorder %s2033_s29, %s3094_s9 }
  0x78   : > { %p2036_p0 = pnand %p2034_p13, %p2595_p8 }
  0x7a   : > { %p2037_p1 = pneg %p2036_p0 }
  0x7c   : > { %p2042_p2 = pnand %p2040_p3, %p2037_p1 }
  0x7e   : > { %2045 = shalt.err (!%p2042_p2)
}
  0x7f   : > { %s2046_s30 = scalar_lea.vmem %s494_s17, 128  ;;  %p2054_p4 = scmp.lt.s32.totalorder %s494_s17, %s494_s17 }
  0x80   : > { %p2047_p5 = scmp.ne.s32.totalorder %s494_s17, %s2046_s30  ;;  %p2055_p10 = scmp.lt.s32.totalorder %s2046_s30, %s2046_s30 }
  0x82   : > { %p2049_p7 = pnand %p2047_p5, %p2595_p8  ;;  %p2056_p11 = por %p2055_p10, %p2054_p4 }
  0x84   : > { %p2050_p9 = pneg %p2049_p7 }
  0x86   : > { %p2057_p12 = pnand %p2056_p11, %p2050_p9 }
  0x88   : > { %2060 = shalt.err (!%p2057_p12)
}
  0x89   : > { %1752 = dma.hbm_to_vmem [thread:$0]  (!%p2579_p6), %s3094_s9, 128, %s494_s17, [#allocation18], %s2442_s25, %s2442_s25, %s2443_s0  }
  0x8a   : > { %s2446_s20 = smov [#allocation20]   ;;  %s2447_s1 = smov [#allocation23]  }
  0x8b   : > { %s518_s16 = sshll.u32 %s2446_s20, 4  ;;  %s540_s22 = sshll.u32 %s2447_s1, 4  ;;  %s519_s16 = int_to_ptr.vmem [resolvable:$true] %s518_s16  ;;  %s541_s22 = int_to_ptr.vmem [resolvable:$true] %s540_s22 }
  0x8c   : > { %s2061_s23 = scalar_lea.hbm %s3096_s11, 16 }
  0x8d   : > { %p2062_p13 = scmp.ne.s32.totalorder %s3096_s11, %s2061_s23  ;;  %p2068_p3 = scmp.lt.u32.totalorder %s2061_s23, %s3096_s11 }
  0x8f   : > { %p2064_p0 = pnand %p2062_p13, %p2595_p8 }
  0x91   : > { %p2065_p1 = pneg %p2064_p0 }
  0x93   : > { %p2070_p2 = pnand %p2068_p3, %p2065_p1 }
  0x95   : > { %2073 = shalt.err (!%p2070_p2)
}
  0x96   : > { %s2074_s25 = scalar_lea.vmem %s519_s16, 16  ;;  %s2081_s0 = scalar_lea.vmem %s519_s16, 32 }
  0x97   : > { %p2075_p5 = scmp.ne.s32.totalorder %s519_s16, %s2074_s25  ;;  %p2082_p4 = scmp.lt.s32.totalorder %s519_s16, %s519_s16 }
  0x98   : > { %p2083_p10 = scmp.lt.s32.totalorder %s2081_s0, %s2074_s25 }
  0x99   : > { %p2077_p7 = pnand %p2075_p5, %p2595_p8 }
  0x9a   : > { %p2084_p11 = por %p2083_p10, %p2082_p4 }
  0x9b   : > { %p2078_p9 = pneg %p2077_p7 }
  0x9d   : > { %p2085_p12 = pnand %p2084_p11, %p2078_p9 }
  0x9f   : > { %2088 = shalt.err (!%p2085_p12)
}
  0xa0   : > { %1758 = dma.hbm_to_vmem [thread:$0]  (!%p2579_p6), %s3096_s11, 16, %s519_s16, [#allocation21]  }
  0xa1   : > { %s2089_s29 = scalar_lea.hbm %s3098_s13, 64 }
  0xa2   : > { %p2090_p13 = scmp.ne.s32.totalorder %s3098_s13, %s2089_s29  ;;  %p2096_p3 = scmp.lt.u32.totalorder %s2089_s29, %s3098_s13 }
  0xa4   : > { %p2092_p0 = pnand %p2090_p13, %p2595_p8 }
  0xa6   : > { %p2093_p1 = pneg %p2092_p0 }
  0xa8   : > { %p2098_p2 = pnand %p2096_p3, %p2093_p1 }
  0xaa   : > { %2101 = shalt.err (!%p2098_p2)
}
  0xab   : > { %s2102_s30 = scalar_lea.vmem %s541_s22, 64  ;;  %p2110_p4 = scmp.lt.s32.totalorder %s541_s22, %s541_s22 }
  0xac   : > { %p2103_p5 = scmp.ne.s32.totalorder %s541_s22, %s2102_s30  ;;  %p2111_p10 = scmp.lt.s32.totalorder %s2102_s30, %s2102_s30 }
  0xae   : > { %p2105_p7 = pnand %p2103_p5, %p2595_p8  ;;  %p2112_p11 = por %p2111_p10, %p2110_p4 }
  0xb0   : > { %p2106_p9 = pneg %p2105_p7 }
  0xb2   : > { %p2113_p12 = pnand %p2112_p11, %p2106_p9 }
  0xb4   : > { %2116 = shalt.err (!%p2113_p12)
}
  0xb5   : > { %1764 = dma.hbm_to_vmem [thread:$0]  (!%p2579_p6), %s3098_s13, 64, %s541_s22, [#allocation24]  }
  0xb6   : > { %s2448_s25 = smov [#allocation7]   ;;  %s2449_s17 = smov [#allocation10]  }
  0xb7   : > { %s415_s0 = sshll.u32 %s2448_s25, 4  ;;  %s437_s19 = sshll.u32 %s2449_s17, 4  ;;  %s416_s0 = int_to_ptr.vmem [resolvable:$true] %s415_s0  ;;  %s438_s19 = int_to_ptr.vmem [resolvable:$true] %s437_s19 }
  0xb8   : > { %s3125_s2 = sld [smem:[#allocation43_spill]] }
  0xbe   : > { %s2117_s29 = scalar_lea.hbm %s3125_s2, 16 }
  0xbf   : > { %p2118_p13 = scmp.ne.s32.totalorder %s3125_s2, %s2117_s29  ;;  %p2124_p3 = scmp.lt.u32.totalorder %s2117_s29, %s3125_s2 }
  0xc1   : > { %p2120_p0 = pnand %p2118_p13, %p2595_p8 }
  0xc3   : > { %p2121_p1 = pneg %p2120_p0 }
  0xc5   : > { %p2126_p2 = pnand %p2124_p3, %p2121_p1 }
  0xc7   : > { %2129 = shalt.err (!%p2126_p2)
}
  0xc8   : > { %s2130_s22 = scalar_lea.vmem %s416_s0, 16  ;;  %s2137_s30 = scalar_lea.vmem %s416_s0, 32 }
  0xc9   : > { %p2131_p5 = scmp.ne.s32.totalorder %s416_s0, %s2130_s22  ;;  %p2138_p4 = scmp.lt.s32.totalorder %s416_s0, %s416_s0 }
  0xca   : > { %p2139_p10 = scmp.lt.s32.totalorder %s2137_s30, %s2130_s22 }
  0xcb   : > { %p2133_p7 = pnand %p2131_p5, %p2595_p8 }
  0xcc   : > { %p2140_p11 = por %p2139_p10, %p2138_p4 }
  0xcd   : > { %p2134_p9 = pneg %p2133_p7 }
  0xcf   : > { %p2141_p12 = pnand %p2140_p11, %p2134_p9 }
  0xd1   : > { %2144 = shalt.err (!%p2141_p12)
}
  0xd2   : > { %1731 = dma.hbm_to_vmem [thread:$0]  (!%p2579_p6), %s3125_s2, 16, %s416_s0, [#allocation6]  }
  0xd3   : > { %s2145_s20 = scalar_lea.hbm %s3089_s4, 16 }
  0xd4   : > { %p2146_p13 = scmp.ne.s32.totalorder %s3089_s4, %s2145_s20  ;;  %p2152_p3 = scmp.lt.u32.totalorder %s2145_s20, %s3089_s4 }
  0xd6   : > { %p2148_p0 = pnand %p2146_p13, %p2595_p8 }
  0xd8   : > { %p2149_p1 = pneg %p2148_p0 }
  0xda   : > { %p2154_p2 = pnand %p2152_p3, %p2149_p1 }
  0xdc   : > { %2157 = shalt.err (!%p2154_p2)
}
  0xdd   : > { %s2158_s27 = scalar_lea.vmem %s438_s19, 16  ;;  %s2165_s0 = scalar_lea.vmem %s438_s19, 32 }
  0xde   : > { %p2159_p5 = scmp.ne.s32.totalorder %s438_s19, %s2158_s27  ;;  %p2166_p4 = scmp.lt.s32.totalorder %s438_s19, %s438_s19 }
  0xdf   : > { %p2167_p10 = scmp.lt.s32.totalorder %s2165_s0, %s2158_s27 }
  0xe0   : > { %p2161_p7 = pnand %p2159_p5, %p2595_p8 }
  0xe1   : > { %p2168_p11 = por %p2167_p10, %p2166_p4 }
  0xe2   : > { %p2162_p9 = pneg %p2161_p7 }
  0xe4   : > { %p2169_p12 = pnand %p2168_p11, %p2162_p9 }
  0xe6   : > { %2172 = shalt.err (!%p2169_p12)
}
  0xe7   : > { %1737 = dma.hbm_to_vmem [thread:$0]  (!%p2579_p6), %s3089_s4, 16, %s438_s19, [#allocation9]  }
  0xe8   : > { %s2450_s30 = smov [#allocation13]   ;;  %s2451_s24 = smov [#allocation16]  }
  0xe9   : > { %s461_s16 = sshll.u32 %s2450_s30, 4  ;;  %s483_s25 = sshll.u32 %s2451_s24, 4  ;;  %s462_s16 = int_to_ptr.vmem [resolvable:$true] %s461_s16  ;;  %s484_s25 = int_to_ptr.vmem [resolvable:$true] %s483_s25 }
  0xea   : > { %s2173_s1 = scalar_lea.hbm %s3091_s6, 16 }
  0xeb   : > { %p2174_p13 = scmp.ne.s32.totalorder %s3091_s6, %s2173_s1  ;;  %p2180_p3 = scmp.lt.u32.totalorder %s2173_s1, %s3091_s6 }
  0xed   : > { %p2176_p0 = pnand %p2174_p13, %p2595_p8 }
  0xef   : > { %p2177_p1 = pneg %p2176_p0 }
  0xf1   : > { %p2182_p2 = pnand %p2180_p3, %p2177_p1 }
  0xf3   : > { %2185 = shalt.err (!%p2182_p2)
}
  0xf4   : > { %s2186_s19 = scalar_lea.vmem %s462_s16, 16  ;;  %s2193_s0 = scalar_lea.vmem %s462_s16, 32 }
  0xf5   : > { %p2187_p5 = scmp.ne.s32.totalorder %s462_s16, %s2186_s19  ;;  %p2194_p4 = scmp.lt.s32.totalorder %s462_s16, %s462_s16 }
  0xf6   : > { %p2195_p10 = scmp.lt.s32.totalorder %s2193_s0, %s2186_s19 }
  0xf7   : > { %p2189_p7 = pnand %p2187_p5, %p2595_p8 }
  0xf8   : > { %p2196_p11 = por %p2195_p10, %p2194_p4 }
  0xf9   : > { %p2190_p9 = pneg %p2189_p7 }
  0xfb   : > { %p2197_p12 = pnand %p2196_p11, %p2190_p9 }
  0xfd   : > { %2200 = shalt.err (!%p2197_p12)
}
  0xfe   : > { %1743 = dma.hbm_to_vmem [thread:$0]  (!%p2579_p6), %s3091_s6, 16, %s462_s16, [#allocation12]  }
  0xff   : > { %s2201_s17 = scalar_lea.hbm %s3093_s8, 16 }
 0x100   : > { %p2202_p13 = scmp.ne.s32.totalorder %s3093_s8, %s2201_s17  ;;  %p2208_p3 = scmp.lt.u32.totalorder %s2201_s17, %s3093_s8 }
 0x102   : > { %p2204_p0 = pnand %p2202_p13, %p2595_p8 }
 0x104   : > { %p2205_p1 = pneg %p2204_p0 }
 0x106   : > { %p2210_p2 = pnand %p2208_p3, %p2205_p1 }
 0x108   : > { %2213 = shalt.err (!%p2210_p2)
}
 0x109   : > { %s2214_s23 = scalar_lea.vmem %s484_s25, 16  ;;  %s2221_s16 = scalar_lea.vmem %s484_s25, 32 }
 0x10a   : > { %p2215_p5 = scmp.ne.s32.totalorder %s484_s25, %s2214_s23  ;;  %p2222_p4 = scmp.lt.s32.totalorder %s484_s25, %s484_s25 }
 0x10b   : > { %p2223_p10 = scmp.lt.s32.totalorder %s2221_s16, %s2214_s23 }
 0x10c   : > { %p2217_p7 = pnand %p2215_p5, %p2595_p8 }
 0x10d   : > { %p2224_p11 = por %p2223_p10, %p2222_p4 }
 0x10e   : > { %p2218_p9 = pneg %p2217_p7 }
 0x110   : > { %p2225_p12 = pnand %p2224_p11, %p2218_p9 }
 0x112   : > { %2228 = shalt.err (!%p2225_p12)
}
 0x113   : > { %1749 = dma.hbm_to_vmem [thread:$0]  (!%p2579_p6), %s3093_s8, 16, %s484_s25, [#allocation15]  }
 0x114   : > { %s2452_s0 = smov [#allocation19]   ;;  %s2453_s22 = smov [#allocation22]  }
 0x115   : > { %s507_s18 = sshll.u32 %s2452_s0, 4  ;;  %s529_s30 = sshll.u32 %s2453_s22, 4  ;;  %s508_s18 = int_to_ptr.vmem [resolvable:$true] %s507_s18  ;;  %s530_s30 = int_to_ptr.vmem [resolvable:$true] %s529_s30 }
 0x116   : > { %s2229_s20 = scalar_lea.hbm %s3095_s10, 16 }
 0x117   : > { %p2230_p13 = scmp.ne.s32.totalorder %s3095_s10, %s2229_s20  ;;  %p2236_p3 = scmp.lt.u32.totalorder %s2229_s20, %s3095_s10 }
 0x119   : > { %p2232_p0 = pnand %p2230_p13, %p2595_p8 }
 0x11b   : > { %p2233_p1 = pneg %p2232_p0 }
 0x11d   : > { %p2238_p2 = pnand %p2236_p3, %p2233_p1 }
 0x11f   : > { %2241 = shalt.err (!%p2238_p2)
}
 0x120   : > { %s2242_s25 = scalar_lea.vmem %s508_s18, 16  ;;  %s2249_s16 = scalar_lea.vmem %s508_s18, 32 }
 0x121   : > { %p2243_p5 = scmp.ne.s32.totalorder %s508_s18, %s2242_s25  ;;  %p2250_p4 = scmp.lt.s32.totalorder %s508_s18, %s508_s18 }
 0x122   : > { %p2251_p10 = scmp.lt.s32.totalorder %s2249_s16, %s2242_s25 }
 0x123   : > { %p2245_p7 = pnand %p2243_p5, %p2595_p8 }
 0x124   : > { %p2252_p11 = por %p2251_p10, %p2250_p4 }
 0x125   : > { %p2246_p9 = pneg %p2245_p7 }
 0x127   : > { %p2253_p12 = pnand %p2252_p11, %p2246_p9 }
 0x129   : > { %2256 = shalt.err (!%p2253_p12)
}
 0x12a   : > { %1755 = dma.hbm_to_vmem [thread:$0]  (!%p2579_p6), %s3095_s10, 16, %s508_s18, [#allocation18]  }
 0x12b   : > { %s2257_s24 = scalar_lea.hbm %s3097_s12, 16 }
 0x12c   : > { %p2258_p13 = scmp.ne.s32.totalorder %s3097_s12, %s2257_s24  ;;  %p2264_p3 = scmp.lt.u32.totalorder %s2257_s24, %s3097_s12 }
 0x12e   : > { %p2260_p0 = pnand %p2258_p13, %p2595_p8 }
 0x130   : > { %p2261_p1 = pneg %p2260_p0 }
 0x132   : > { %p2266_p2 = pnand %p2264_p3, %p2261_p1 }
 0x134   : > { %2269 = shalt.err (!%p2266_p2)
}
 0x135   : > { %s2270_s15 = scalar_lea.vmem %s530_s30, 16  ;;  %s2277_s18 = scalar_lea.vmem %s530_s30, 32 }
 0x136   : > { %p2271_p5 = scmp.ne.s32.totalorder %s530_s30, %s2270_s15  ;;  %p2278_p4 = scmp.lt.s32.totalorder %s530_s30, %s530_s30 }
 0x137   : > { %p2279_p10 = scmp.lt.s32.totalorder %s2277_s18, %s2270_s15 }
 0x138   : > { %p2273_p7 = pnand %p2271_p5, %p2595_p8 }
 0x139   : > { %p2280_p11 = por %p2279_p10, %p2278_p4 }
 0x13a   : > { %p2274_p9 = pneg %p2273_p7 }
 0x13c   : > { %p2281_p12 = pnand %p2280_p11, %p2274_p9 }
 0x13e   : > { %2284 = shalt.err (!%p2281_p12)
}
 0x13f   : > { %1761 = dma.hbm_to_vmem [thread:$0]  (!%p2579_p6), %s3097_s12, 16, %s530_s30, [#allocation21]  }
 0x140   : > { %s2454_s16 = smov [#allocation25]   ;;  %s2285_s22 = scalar_lea.hbm %s3099_s14, 16 }
 0x141   : > { %s551_s27 = sshll.u32 %s2454_s16, 4  ;;  %p2286_p13 = scmp.ne.s32.totalorder %s3099_s14, %s2285_s22  ;;  %s552_s27 = int_to_ptr.vmem [resolvable:$true] %s551_s27 }
 0x142   : > { %p2292_p3 = scmp.lt.u32.totalorder %s2285_s22, %s3099_s14 }
 0x143   : > { %p2288_p0 = pnand %p2286_p13, %p2595_p8 }
 0x145   : > { %p2289_p1 = pneg %p2288_p0 }
 0x147   : > { %p2294_p2 = pnand %p2292_p3, %p2289_p1 }
 0x149   : > { %2297 = shalt.err (!%p2294_p2)
}
 0x14a   : > { %s2298_s30 = scalar_lea.vmem %s552_s27, 16  ;;  %s2305_s29 = scalar_lea.vmem %s552_s27, 32 }
 0x14b   : > { %p2299_p5 = scmp.ne.s32.totalorder %s552_s27, %s2298_s30  ;;  %p2306_p4 = scmp.lt.s32.totalorder %s552_s27, %s552_s27 }
 0x14c   : > { %p2307_p10 = scmp.lt.s32.totalorder %s2305_s29, %s2298_s30 }
 0x14d   : > { %p2301_p7 = pnand %p2299_p5, %p2595_p8 }
 0x14e   : > { %p2308_p11 = por %p2307_p10, %p2306_p4 }
 0x14f   : > { %p2302_p9 = pneg %p2301_p7 }
 0x151   : > { %p2309_p12 = pnand %p2308_p11, %p2302_p9 }
 0x153   : > { %2312 = shalt.err (!%p2309_p12)
}
 0x154   : > { %s3126_s23 = sld [smem:[#allocation38_spill]]  ;;  %s3127_s25 = sld [smem:[#allocation37_spill]] }
 0x155   : > { %s3128_s26 = sld [smem:[#allocation36_spill]]  ;;  %s3129_s16 = sld [smem:[#allocation39_spill]] }
 0x156   : > { %1767 = dma.hbm_to_vmem [thread:$0]  (!%p2579_p6), %s3099_s14, 16, %s552_s27, [#allocation24]  }
 0x157   : > { %s1555_s19 = sadd.s32 4294967294, %s2437_s21   ;;  %s2872_s28 = sadd.s32 1, %s2437_s21  }
 0x158   : > { %s42_s0 = ssub.s32 %s2437_s21, %s2872_s28  ;;  %p53_p0 = scmp.eq.s32.totalorder %s2437_s21, 0 }
 0x159   : > { %p43_p8 = scmp.eq.s32.totalorder %s42_s0, 0  ;;  %p382_p7 = scmp.eq.s32.totalorder %s1555_s19, 1 }
 0x15a   : > { %s45_s22 = sadd.s32 1, %s3126_s23  ;;  %p52_p13 = scmp.ne.s32.totalorder %s3126_s23, %s3127_s25 }
 0x15b   : > { %p58_p1 = scmp.ne.s32.totalorder %s3127_s25, %s3128_s26  ;;  %p3131_p2 = scmp.eq.s32.totalorder %s3129_s16, 0 }
 0x15c   : > { %s2883_s24 = scalar_select %p43_p8, %s3126_s23, %s45_s22  }
 0x15d   : > { %p2885_p3 = por %p53_p0, %p52_p13  ;;  %p2891_p6 = por %p3131_p2, %p58_p1 }
 0x15e   : > { %p376_p5 = scmp.eq.s32.totalorder %s3129_s16, 1  ;;  %p1790_p9 = scmp.lt.s32.totalorder %s2437_s21, 2 }
 0x15f   : > { %s562_s20 = sand.u32 1, %s3126_s23   ;;  %p2902_p10 = por %p382_p7, %p58_p1 }
 0x160   : > { %p2898_p4 = por %p376_p5, %p52_p13  ;;  %s1572_s29 = sshll.u32 %s562_s20, 5 }
 0x161   : > { %s3134_s30 = scalar_select %p2902_p10, 1, 0 }
 0x162   : > { %s3133_s1 = scalar_select %p2898_p4, 1, 0 }
 0x163   : > { %s1623_s15 = sshll.u32 %s2437_s21, 9  ;;  %s3135_s26 = sld [smem:[#allocation41_spill]] }
 0x164   : > { %s566_s23 = scalar_lea.vmem [#allocation2], %s1572_s29  ;;  %p2916_p11 = pnand %p1790_p9, %p2885_p3 }
 0x165   : > { %s573_s16 = sshll.u32 %s566_s23, 4  ;;  %s2920_s22 = scalar_lea.sflag [#allocation3], %s562_s20  ;;  %s2912_s16 = int_to_ptr.vmem [resolvable:$true] %s573_s16 }
 0x166   : > { %p2315_p8 = pneg %p2916_p11 }
 0x169   : > { %s2910_s0 = scalar_lea.hbm %s3135_s26, %s1623_s15  ;;  %s2318_s17 = scalar_lea.hbm %s3135_s26, 1024 }
 0x16a   : > { %s2313_s18 = scalar_lea.hbm %s2910_s0, 512  ;;  %p2319_p1 = scmp.lt.u32.totalorder %s2910_s0, %s3135_s26 }
 0x16b   : > { %p2314_p12 = scmp.ne.s32.totalorder %s2910_s0, %s2313_s18  ;;  %p2320_p3 = scmp.lt.u32.totalorder %s2318_s17, %s2313_s18 }
 0x16c   : > { %p2322_p5 = scmp.lt.u32.totalorder %s2313_s18, %s2910_s0 }
 0x16d   : > { %p2316_p13 = pnand %p2315_p8, %p2314_p12  ;;  %p2321_p2 = por %p2320_p3, %p2319_p1 }
 0x16f   : > { %p2317_p0 = pneg %p2316_p13  ;;  %p2323_p7 = por %p2322_p5, %p2321_p2 }
 0x171   : > { %p2324_p9 = pnand %p2323_p7, %p2317_p0 }
 0x173   : > { %2327 = shalt.err (!%p2324_p9)
}
 0x174   : > { %s2328_s20 = scalar_lea.vmem %s2912_s16, 512  ;;  %s2455_s29 = smov [#allocation2]  }
 0x175   : > { %p2329_p12 = scmp.ne.s32.totalorder %s2912_s16, %s2328_s20  ;;  %s2333_s15 = sshll.u32 %s2455_s29, 4  ;;  %s2334_s15 = int_to_ptr.vmem [resolvable:$false] %s2333_s15 }
 0x176   : > { %s2335_s25 = scalar_lea.vmem %s2334_s15, 1024  ;;  %p2336_p4 = scmp.lt.s32.totalorder %s2912_s16, %s2334_s15 }
 0x177   : > { %p2331_p13 = pnand %p2329_p12, %p2315_p8  ;;  %p2337_p1 = scmp.lt.s32.totalorder %s2335_s25, %s2328_s20 }
 0x179   : > { %p2332_p10 = pneg %p2331_p13  ;;  %p2338_p3 = por %p2337_p1, %p2336_p4 }
 0x17b   : > { %p2339_p2 = pnand %p2338_p3, %p2332_p10 }
 0x17d   : > { %2342 = shalt.err (!%p2339_p2)
}
 0x17e   : > { %s2456_s18 = smov 128   ;;  %s2457_s17 = smov 8  }
 0x17f   : > { %1771 = dma.hbm_to_vmem [thread:$0]  (!%p2916_p11), %s2910_s0, 512, %s2912_s16, %s2920_s22, %s2456_s18, %s2456_s18, %s2457_s17  }
 0x180   : > { %s3137_s23 = sld [smem:[#allocation40_spill]] }
 0x186   : > { %p3138_p8 = scmp.ne.s32.totalorder %s3137_s23, 0 }
 0x187   : > { %s3139_s2 = sld [smem:[#allocation37_spill]] (!%p3138_p8) }
 0x188   : > { %585 = sbr.rel (%p3138_p8) target bundleno = 2606 (0xa2e), region = 80 }
 0x18d   : > { %s2951_s29 = sand.u32 (!%p3138_p8), 1, %s3139_s2  }
 0x18e   : > { %s1576_s20 = sshll.u32 (!%p3138_p8), %s2951_s29, 5  ;;  %s588_s15 = scalar_lea.sflag (!%p3138_p8), [#allocation3], %s2951_s29 }
 0x18f   : > { %s591_s25 = scalar_lea.vmem [#allocation2], %s1576_s20 }
 0x190   : > { %2388 = dma.done.wait (%p2891_p6), %s588_s15, 512  }
 0x191   : > { %2390 = vsyncadd (%p2891_p6), %s588_s15, 4294966784  ;;  %s3140_s0 = sld [smem:[#allocation39_spill]] }
 0x197   : > { %p3141_p4 = scmp.eq.s32.totalorder %s3140_s0, 0 }
 0x199   : > { %2392 = dma.done.wait (%p3141_p4), [#allocation6], 144   ;;  %p3142_p10 = pmov %p3141_p4 }
 0x19a   : > { %p3143_p11 = pmov %p3141_p4 }
 0x19b   : > { %2394 = vsyncadd (%p3142_p10), [#allocation6], 4294967152 }
 0x19c   : > { %2396 = dma.done.wait (%p3143_p11), [#allocation9], 32   ;;  %p3144_p0 = pmov %p3141_p4 }
 0x19e   : > { %2398 = vsyncadd (%p3144_p0), [#allocation9], 4294967264  ;;  %p3145_p5 = pmov %p3144_p0 }
 0x19f   : > { %p3146_p7 = pmov %p3144_p0 }
 0x1a0   : > { %2400 = dma.done.wait (%p3145_p5), [#allocation12], 272  }
 0x1a1   : > { %2402 = vsyncadd (%p3146_p7), [#allocation12], 4294967024  ;;  %p3147_p6 = pmov %p3144_p0 }
 0x1a2   : > { %p3148_p9 = pmov %p3144_p0 }
 0x1a3   : > { %2404 = dma.done.wait (%p3147_p6), [#allocation15], 32  }
 0x1a4   : > { %2406 = vsyncadd (%p3148_p9), [#allocation15], 4294967264  ;;  %p3149_p12 = pmov %p3144_p0 }
 0x1a5   : > { %p3150_p13 = pmov %p3144_p0 }
 0x1a6   : > { %2408 = dma.done.wait (%p3149_p12), [#allocation18], 144  }
 0x1a7   : > { %2410 = vsyncadd (%p3150_p13), [#allocation18], 4294967152  ;;  %p3151_p1 = pmov %p3144_p0 }
 0x1a8   : > { %p3152_p3 = pmov %p3144_p0 }
 0x1a9   : > { %2412 = dma.done.wait (%p3151_p1), [#allocation21], 32  }
 0x1aa   : > { %2414 = vsyncadd (%p3152_p3), [#allocation21], 4294967264  ;;  %p3153_p2 = pmov %p3144_p0 }
 0x1ab   : > { %p3154_p8 = pmov %p3144_p0 }
 0x1ac   : > { %2416 = dma.done.wait (%p3153_p2), [#allocation24], 80  }
 0x1ad   : > { %2418 = vsyncadd (%p3154_p8), [#allocation24], 4294967216  ;;  %v1861_v0 = vld [vmem:[#allocation5] sm:$0xff]   ;;  %v698_v2 = vld [vmem:[%s591_s25 + $0x8] sm:$0xff]  ;;  %vm718_vm0 = vcmask 130048   ;;  %vm778_vm1 = vcmask 261120  }
 0x1ae   : > { %v697_v1 = vld [vmem:[%s591_s25] sm:$0xff]  ;;  %v699_v3 = vld [vmem:[%s591_s25 + $0x10] sm:$0xff]  ;;  %1638 = vmatprep.subr.bf16.mxu0 %v1861_v0  ;;  %v700_v5 = vld [vmem:[%s591_s25 + $0x18] sm:$0xff]  ;;  %vm1089_vm2 = vcmask 64512   ;;  %vm1181_vm3 = vcmask 1043456   ;;  %vm1234_vm4 = vcmask 31744  }
 0x1af   : > { %v701_v4 = vpack.c.bf16 %v698_v2, %v697_v1  ;;  %1639 = vmatpush3.bf16.msra.mxu0 %v1861_v0  ;;  %v702_v6 = vpack.c.bf16 %v700_v5, %v699_v3  ;;  %v1592_v7 = vld [vmem:[#allocation7] ss:$0 sm:$0xff]  ;;  %v1862_v44 = vld [vmem:[#allocation11] sm:$0xff]   ;;  %v1863_v45 = vld [vmem:[#allocation11 + $0x8] sm:$0xff]   ;;  %s693_s2 = scalar_lea.vmem [#allocation26], %s1576_s20  ;;  %s1624_s16 = sshll.u32 %s3140_s0, 9 }
 0x1b0   : > { %1644 = vmatprep.subr.bf16.mxu1 %v1862_v44  ;;  %v1596_v58 = vld [vmem:[#allocation8] ss:$0 sm:$0xff]  ;;  %v1597_v1 = vld [vmem:[#allocation10] ss:$0 sm:$0xff]  ;;  %s1349_s27 = sshll.u32 %s693_s2, 4  ;;  %s3155_s18 = sld [smem:[#allocation44_spill]]  ;;  %s3034_s27 = int_to_ptr.vmem [resolvable:$true] %s1349_s27 }
 0x1b1   : > { %1640 = vmatprep.mubr.msk.bf16.mxu0 %vm718_vm0, %v701_v4  ;;  %1645 = vmatpush3.bf16.msra.mxu1 %v1862_v44  ;;  %s1336_s20 = scalar_lea.sflag [#allocation4], %s2951_s29  ;;  %s2343_s15 = scalar_lea.vmem %s3034_s27, 512 }
 0x1b2   : > { %1641 = vmatmul.mubr.msk.bf16.vlgmr.msra.gmra.mrb[0].mxu0 %vm718_vm0, %v702_v6  ;;  %1646 = vmatprep.subr.bf16.mxu1 %v1863_v45  ;;  %p2344_p4 = scmp.ne.s32.totalorder %s3034_s27, %s2343_s15  ;;  %p3157_p10 = scmp.ne.s32.totalorder %s3133_s1, 0 }
 0x1b3   : > { %s2459_s25 = smov [#allocation26]  }
 0x1b4   : > { %p2345_p11 = pnand %p2344_p4, %p3157_p10  ;;  %s2347_s0 = sshll.u32 %s2459_s25, 4  ;;  %s2348_s0 = int_to_ptr.vmem [resolvable:$false] %s2347_s0 }
 0x1b5   : > { %1647 = vmatpush3.bf16.msra.mxu1 %v1863_v45  ;;  %s2349_s19 = scalar_lea.vmem %s2348_s0, 1024  ;;  %p2350_p5 = scmp.lt.s32.totalorder %s3034_s27, %s2348_s0 }
 0x1b6   : > { %s3156_s17 = smov %s3155_s18  ;;  %s3039_s23 = scalar_lea.hbm %s3155_s18, %s1624_s16 }
 0x1b7   : > { %p2346_p0 = pneg %p2345_p11  ;;  %p2351_p7 = scmp.lt.s32.totalorder %s2349_s19, %s2343_s15 }
 0x1b9   : > { %p2352_p6 = por %p2351_p7, %p2350_p5 }
 0x1bb   : > { %p2353_p9 = pnand %p2352_p6, %p2346_p0 }
 0x285   : > { %v1642_v8 = vpop.f32.mrb[0].mxu0 }
 0x286   : > { %v768_v9 = vadd.f32 %v1642_v8, %v1592_v7  ;;  %v759_v10 = vpop.f32.mrb[1].mxu0 }
 0x287   : > { %v760_v11 = vadd.f32 %v1592_v7, %v759_v10  ;;  %v1643_v12 = vpop.f32.mrb[2].mxu0 }
 0x288   : > { %v776_v13 = vmax.f32 %v768_v9, 0.0  ;;  %v771_v14 = vadd.f32 %v1643_v12, %v1592_v7  ;;  %v762_v15 = vpop.f32.mrb[3].mxu0 }
 0x289   : > { %v774_v16 = vmax.f32 %v760_v11, 0.0  ;;  %v763_v17 = vadd.f32 %v1592_v7, %v762_v15 }
 0x28a   : > { %v777_v18 = vmax.f32 %v771_v14, 0.0  ;;  %v785_v19 = vsel %vm778_vm1, %v776_v13, 0.0  ;;  %v1598_v14 = vld [vmem:[#allocation13] ss:$0 sm:$0xff] }
 0x28b   : > { %v775_v20 = vmax.f32 %v763_v17, 0.0  ;;  %786 = vadd.xlane.f32.xlu1 %v785_v19  ;;  %v779_v21 = vsel %vm778_vm1, %v774_v16, 0.0 }
 0x28c   : > { %780 = vadd.xlane.f32.xlu0 %v779_v21  ;;  %v788_v22 = vsel %vm778_vm1, %v777_v18, 0.0 }
 0x28d   : > { %v782_v23 = vsel %vm778_vm1, %v775_v20, 0.0 }
 0x28f   : > { %789 = vadd.xlane.f32.xlu1 %v788_v22 }
 0x290   : > { %783 = vadd.xlane.f32.xlu0 %v782_v23 }
 0x318   : > { %v787_v24 = vpop.xlane.xlu1 %786 }
 0x319   : > { %v794_v25 = vmul.f32 0.03125, %v787_v24  ;;  %v781_v26 = vpop.xlane.xlu0 %780 }
 0x31a   : > { %v792_v27 = vmul.f32 0.03125, %v781_v26 }
 0x31b   : > { %v798_v28 = vsub.f32 %v776_v13, %v794_v25 }
 0x31c   : > { %v796_v29 = vsub.f32 %v774_v16, %v792_v27  ;;  %v790_v30 = vpop.xlane.xlu1 %789 }
 0x31d   : > { %v795_v31 = vmul.f32 0.03125, %v790_v30  ;;  %v784_v32 = vpop.xlane.xlu0 %783  ;;  %v802_v38 = vmul.f32 %v798_v28, %v798_v28 }
 0x31e   : > { %v793_v33 = vmul.f32 0.03125, %v784_v32  ;;  %v800_v34 = vmul.f32 %v796_v29, %v796_v29 }
 0x31f   : > { %v799_v35 = vsub.f32 %v777_v18, %v795_v31  ;;  %v810_v40 = vsel %vm778_vm1, %v802_v38, 0.0 }
 0x320   : > { %v797_v36 = vsub.f32 %v775_v20, %v793_v33  ;;  %v804_v37 = vsel %vm778_vm1, %v800_v34, 0.0 }
 0x321   : > { %805 = vadd.xlane.f32.xlu0 %v804_v37  ;;  %v803_v42 = vmul.f32 %v799_v35, %v799_v35 }
 0x322   : > { %v801_v39 = vmul.f32 %v797_v36, %v797_v36 }
 0x323   : > { %v813_v43 = vsel %vm778_vm1, %v803_v42, 0.0 }
 0x324   : > { %v807_v41 = vsel %vm778_vm1, %v801_v39, 0.0 }
 0x325   : > { %811 = vadd.xlane.f32.xlu0 %v810_v40  ;;  %808 = vadd.xlane.f32.xlu1 %v807_v41 }
 0x329   : > { %814 = vadd.xlane.f32.xlu1 %v813_v43 }
 0x3ae   : > { %v806_v46 = vpop.xlane.xlu0 %805 }
 0x3af   : > { %v816_v47 = vmul.f32 0.03125, %v806_v46 }
 0x3b1   : > { %v821_v48 = vadd.f32 1e-05, %v816_v47 }
 0x3b2   : > { %v809_v49 = vpop.xlane.xlu1 %808  ;;  %v812_v50 = vpop.xlane.xlu0 %811 }
 0x3b3   : > { %1865 = vrsqrt.f32 %v821_v48  ;;  %v817_v51 = vmul.f32 0.03125, %v809_v49  ;;  %v818_v52 = vmul.f32 0.03125, %v812_v50 }
 0x3b5   : > { %v822_v53 = vadd.f32 1e-05, %v817_v51  ;;  %v823_v54 = vadd.f32 1e-05, %v818_v52  ;;  %v1864_v51 = vld [vmem:[#allocation17] sm:$0xff]  }
 0x3b6   : > { %v815_v55 = vpop.xlane.xlu1 %814  ;;  %1652 = vmatprep.subr.bf16.mxu0 %v1864_v51 }
 0x3b7   : > { %1867 = vrsqrt.f32 %v822_v53  ;;  %v819_v56 = vmul.f32 0.03125, %v815_v55  ;;  %1653 = vmatpush3.bf16.msra.mxu0 %v1864_v51 }
 0x3b8   : > { %1869 = vrsqrt.f32 %v823_v54 }
 0x3b9   : > { %v824_v57 = vadd.f32 1e-05, %v819_v56 }
 0x3bb   : > { %1871 = vrsqrt.f32 %v824_v57 }
 0x3bd   : > { %v1866_v59 = vpop.eup %1865 }
 0x3be   : > { %v835_v60 = vmul.f32 %v1866_v59, %v1596_v58 }
 0x3c0   : > { %v839_v0 = vmul.f32 %v835_v60, %v796_v29 }
 0x3c1   : > { %v1868_v61 = vpop.eup %1867 }
 0x3c2   : > { %v1870_v62 = vpop.eup %1869  ;;  %v836_v63 = vmul.f32 %v1868_v61, %v1596_v58  ;;  %v850_v5 = vadd.f32 %v1597_v1, %v839_v0  ;;  %v1603_v0 = vld [vmem:[#allocation14] ss:$0 sm:$0xff] }
 0x3c3   : > { %v837_v2 = vmul.f32 %v1870_v62, %v1596_v58 }
 0x3c4   : > { %v840_v3 = vmul.f32 %v836_v63, %v797_v36 }
 0x3c5   : > { %v1872_v4 = vpop.eup %1871  ;;  %v841_v8 = vmul.f32 %v837_v2, %v798_v28 }
 0x3c6   : > { %v851_v6 = vadd.f32 %v1597_v1, %v840_v3  ;;  %v838_v7 = vmul.f32 %v1872_v4, %v1596_v58 }
 0x3c7   : > { %v852_v11 = vadd.f32 %v1597_v1, %v841_v8 }
 0x3c8   : > { %v854_v9 = vpack.c.bf16 %v851_v6, %v850_v5  ;;  %v842_v10 = vmul.f32 %v838_v7, %v799_v35  ;;  %v1604_v7 = vld [vmem:[#allocation16] ss:$0 sm:$0xff] }
 0x3ca   : > { %1648 = vmatprep.mubr.msk.bf16.mxu1 %vm778_vm1, %v854_v9  ;;  %v853_v12 = vadd.f32 %v1597_v1, %v842_v10 }
 0x3cc   : > { %v855_v13 = vpack.c.bf16 %v853_v12, %v852_v11 }
 0x3ce   : > { %1649 = vmatmul.mubr.msk.bf16.vlgmr.msra.gmra.mrb[0].mxu1 %vm778_vm1, %v855_v13 }
 0x4a1   : > { %v1650_v15 = vpop.f32.mrb[0].mxu1 }
 0x4a2   : > { %v919_v16 = vpop.f32.mrb[1].mxu1  ;;  %v928_v17 = vadd.f32 %v1650_v15, %v1598_v14 }
 0x4a3   : > { %v920_v18 = vadd.f32 %v1598_v14, %v919_v16  ;;  %v1651_v19 = vpop.f32.mrb[2].mxu1 }
 0x4a4   : > { %v922_v20 = vpop.f32.mrb[3].mxu1  ;;  %v931_v22 = vadd.f32 %v1651_v19, %v1598_v14  ;;  %v936_v24 = vmax.f32 %v928_v17, 0.0 }
 0x4a5   : > { %v934_v21 = vmax.f32 %v920_v18, 0.0  ;;  %v923_v23 = vadd.f32 %v1598_v14, %v922_v20  ;;  %v1605_v20 = vld [vmem:[#allocation19] ss:$0 sm:$0xff] }
 0x4a6   : > { %v937_v27 = vmax.f32 %v931_v22, 0.0  ;;  %v944_v29 = vsel %vm718_vm0, %v936_v24, 0.0 }
 0x4a7   : > { %v935_v25 = vmax.f32 %v923_v23, 0.0  ;;  %v938_v26 = vsel %vm718_vm0, %v934_v21, 0.0 }
 0x4a8   : > { %939 = vadd.xlane.f32.xlu0 %v938_v26  ;;  %v947_v30 = vsel %vm718_vm0, %v937_v27, 0.0 }
 0x4a9   : > { %v941_v28 = vsel %vm718_vm0, %v935_v25, 0.0 }
 0x4aa   : > { %942 = vadd.xlane.f32.xlu1 %v941_v28 }
 0x4ac   : > { %945 = vadd.xlane.f32.xlu0 %v944_v29 }
 0x4ae   : > { %948 = vadd.xlane.f32.xlu1 %v947_v30 }
 0x535   : > { %v940_v31 = vpop.xlane.xlu0 %939 }
 0x536   : > { %v951_v32 = vmul.f32 0.0625, %v940_v31 }
 0x537   : > { %v943_v33 = vpop.xlane.xlu1 %942 }
 0x538   : > { %v955_v34 = vsub.f32 %v934_v21, %v951_v32  ;;  %v952_v35 = vmul.f32 0.0625, %v943_v33 }
 0x539   : > { %v946_v36 = vpop.xlane.xlu0 %945 }
 0x53a   : > { %v956_v37 = vsub.f32 %v935_v25, %v952_v35  ;;  %v953_v38 = vmul.f32 0.0625, %v946_v36  ;;  %v959_v39 = vmul.f32 %v955_v34, %v955_v34 }
 0x53b   : > { %v949_v40 = vpop.xlane.xlu1 %948 }
 0x53c   : > { %v957_v41 = vsub.f32 %v936_v24, %v953_v38  ;;  %v954_v42 = vmul.f32 0.0625, %v949_v40  ;;  %v963_v43 = vsel %vm718_vm0, %v959_v39, 0.0  ;;  %v960_v44 = vmul.f32 %v956_v37, %v956_v37 }
 0x53d   : > { %964 = vadd.xlane.f32.xlu0 %v963_v43 }
 0x53e   : > { %v958_v45 = vsub.f32 %v937_v27, %v954_v42  ;;  %v966_v46 = vsel %vm718_vm0, %v960_v44, 0.0  ;;  %v961_v47 = vmul.f32 %v957_v41, %v957_v41 }
 0x53f   : > { %967 = vadd.xlane.f32.xlu1 %v966_v46 }
 0x540   : > { %v969_v48 = vsel %vm718_vm0, %v961_v47, 0.0  ;;  %v962_v49 = vmul.f32 %v958_v45, %v958_v45 }
 0x541   : > { %970 = vadd.xlane.f32.xlu0 %v969_v48 }
 0x542   : > { %v972_v50 = vsel %vm718_vm0, %v962_v49, 0.0 }
 0x543   : > { %973 = vadd.xlane.f32.xlu1 %v972_v50 }
 0x5ca   : > { %v965_v52 = vpop.xlane.xlu0 %964 }
 0x5cb   : > { %v975_v53 = vmul.f32 0.0625, %v965_v52 }
 0x5cc   : > { %v968_v54 = vpop.xlane.xlu1 %967 }
 0x5cd   : > { %v980_v55 = vadd.f32 1e-05, %v975_v53  ;;  %v976_v56 = vmul.f32 0.0625, %v968_v54 }
 0x5ce   : > { %v971_v57 = vpop.xlane.xlu0 %970 }
 0x5cf   : > { %1873 = vrsqrt.f32 %v980_v55  ;;  %v981_v58 = vadd.f32 1e-05, %v976_v56  ;;  %v977_v59 = vmul.f32 0.0625, %v971_v57  ;;  %v1167_v57 = vld [vmem:[#allocation23] sm:$0xf] }
 0x5d0   : > { %v974_v60 = vpop.xlane.xlu1 %973  ;;  %1664 = vmatprep.subr.msk.bf16.mxu1 %vm1181_vm3, %v1167_v57 }
 0x5d1   : > { %1875 = vrsqrt.f32 %v981_v58  ;;  %v982_v61 = vadd.f32 1e-05, %v977_v59  ;;  %v978_v62 = vmul.f32 0.0625, %v974_v60  ;;  %v1183_v58 = vsel %vm1181_vm3, %v1167_v57, 0 }
 0x5d2   : > { %1659 = vmatpush3.bf16.msra.mxu1 %v1183_v58 }
 0x5d3   : > { %1877 = vrsqrt.f32 %v982_v61  ;;  %v983_v63 = vadd.f32 1e-05, %v978_v62 }
 0x5d5   : > { %1879 = vrsqrt.f32 %v983_v63 }
 0x5d9   : > { %v1874_v1 = vpop.eup %1873 }
 0x5da   : > { %v994_v2 = vmul.f32 %v1874_v1, %v1603_v0 }
 0x5db   : > { %v1876_v3 = vpop.eup %1875 }
 0x5dc   : > { %v995_v4 = vmul.f32 %v1876_v3, %v1603_v0  ;;  %v998_v5 = vmul.f32 %v994_v2, %v955_v34 }
 0x5dd   : > { %v1878_v6 = vpop.eup %1877 }
 0x5de   : > { %v996_v8 = vmul.f32 %v1878_v6, %v1603_v0  ;;  %v999_v9 = vmul.f32 %v995_v4, %v956_v37  ;;  %v1009_v13 = vadd.f32 %v1604_v7, %v998_v5 }
 0x5df   : > { %v1880_v10 = vpop.eup %1879 }
 0x5e0   : > { %v1000_v11 = vmul.f32 %v996_v8, %v957_v41  ;;  %v997_v12 = vmul.f32 %v1880_v10, %v1603_v0  ;;  %v1010_v14 = vadd.f32 %v1604_v7, %v999_v9 }
 0x5e2   : > { %v1001_v15 = vmul.f32 %v997_v12, %v958_v45  ;;  %v1013_v16 = vpack.c.bf16 %v1010_v14, %v1009_v13  ;;  %v1011_v17 = vadd.f32 %v1604_v7, %v1000_v11  ;;  %v1610_v14 = vld [vmem:[#allocation22] ss:$0 sm:$0xff] }
 0x5e4   : > { %1654 = vmatprep.mubr.msk.bf16.mxu0 %vm718_vm0, %v1013_v16  ;;  %v1012_v18 = vadd.f32 %v1604_v7, %v1001_v15  ;;  %v1609_v7 = vld [vmem:[#allocation20] ss:$0 sm:$0xff] }
 0x5e6   : > { %v1014_v19 = vpack.c.bf16 %v1012_v18, %v1011_v17 }
 0x5e8   : > { %1655 = vmatmul.mubr.msk.bf16.vlgmr.msra.gmra.mrb[4].mxu0 %vm718_vm0, %v1014_v19 }
 0x6bb   : > { %v1656_v21 = vpop.f32.mrb[4].mxu0 }
 0x6bc   : > { %v1070_v22 = vpop.f32.mrb[5].mxu0  ;;  %v1079_v23 = vadd.f32 %v1656_v21, %v1605_v20 }
 0x6bd   : > { %v1071_v24 = vadd.f32 %v1605_v20, %v1070_v22  ;;  %v1657_v25 = vpop.f32.mrb[6].mxu0 }
 0x6be   : > { %v1073_v26 = vpop.f32.mrb[7].mxu0  ;;  %v1082_v28 = vadd.f32 %v1657_v25, %v1605_v20  ;;  %v1087_v30 = vmax.f32 %v1079_v23, 0.0 }
 0x6bf   : > { %v1085_v27 = vmax.f32 %v1071_v24, 0.0  ;;  %v1074_v29 = vadd.f32 %v1605_v20, %v1073_v26 }
 0x6c0   : > { %v1088_v33 = vmax.f32 %v1082_v28, 0.0  ;;  %v1096_v35 = vsel %vm1089_vm2, %v1087_v30, 0.0  ;;  %v1611_v28 = vld [vmem:[#allocation25] ss:$0 sm:$0xff] }
 0x6c1   : > { %v1086_v31 = vmax.f32 %v1074_v29, 0.0  ;;  %v1090_v32 = vsel %vm1089_vm2, %v1085_v27, 0.0 }
 0x6c2   : > { %1091 = vadd.xlane.f32.xlu0 %v1090_v32  ;;  %v1099_v36 = vsel %vm1089_vm2, %v1088_v33, 0.0 }
 0x6c3   : > { %v1093_v34 = vsel %vm1089_vm2, %v1086_v31, 0.0 }
 0x6c4   : > { %1094 = vadd.xlane.f32.xlu1 %v1093_v34 }
 0x6c6   : > { %1097 = vadd.xlane.f32.xlu0 %v1096_v35 }
 0x6c8   : > { %1100 = vadd.xlane.f32.xlu1 %v1099_v36 }
 0x74f   : > { %v1092_v37 = vpop.xlane.xlu0 %1091 }
 0x750   : > { %v1103_v38 = vmul.f32 0.125, %v1092_v37 }
 0x751   : > { %v1095_v39 = vpop.xlane.xlu1 %1094 }
 0x752   : > { %v1107_v40 = vsub.f32 %v1085_v27, %v1103_v38  ;;  %v1104_v41 = vmul.f32 0.125, %v1095_v39  ;;  %v2458_v27 = vmov 4  }
 0x753   : > { %v1098_v42 = vpop.xlane.xlu0 %1097  ;;  %1860 = vset.pattern.permute.xlu1 %v2458_v27  ;;  %1859 = vset.pattern.permute.xlu0 %v2458_v27 }
 0x754   : > { %v1108_v43 = vsub.f32 %v1086_v31, %v1104_v41  ;;  %v1105_v44 = vmul.f32 0.125, %v1098_v42  ;;  %v1111_v45 = vmul.f32 %v1107_v40, %v1107_v40 }
 0x755   : > { %v1101_v46 = vpop.xlane.xlu1 %1100 }
 0x756   : > { %v1109_v47 = vsub.f32 %v1087_v30, %v1105_v44  ;;  %v1106_v48 = vmul.f32 0.125, %v1101_v46  ;;  %v1115_v49 = vsel %vm1089_vm2, %v1111_v45, 0.0  ;;  %v1112_v50 = vmul.f32 %v1108_v43, %v1108_v43 }
 0x757   : > { %1116 = vadd.xlane.f32.xlu0 %v1115_v49 }
 0x758   : > { %v1110_v51 = vsub.f32 %v1088_v33, %v1106_v48  ;;  %v1118_v52 = vsel %vm1089_vm2, %v1112_v50, 0.0  ;;  %v1113_v53 = vmul.f32 %v1109_v47, %v1109_v47 }
 0x759   : > { %1119 = vadd.xlane.f32.xlu1 %v1118_v52 }
 0x75a   : > { %v1121_v54 = vsel %vm1089_vm2, %v1113_v53, 0.0  ;;  %v1114_v55 = vmul.f32 %v1110_v51, %v1110_v51 }
 0x75b   : > { %1122 = vadd.xlane.f32.xlu0 %v1121_v54 }
 0x75c   : > { %v1124_v56 = vsel %vm1089_vm2, %v1114_v55, 0.0 }
 0x75d   : > { %1125 = vadd.xlane.f32.xlu1 %v1124_v56 }
 0x7e4   : > { %v1117_v59 = vpop.xlane.xlu0 %1116 }
 0x7e5   : > { %v1127_v60 = vmul.f32 0.125, %v1117_v59 }
 0x7e6   : > { %v1120_v61 = vpop.xlane.xlu1 %1119 }
 0x7e7   : > { %v1132_v62 = vadd.f32 1e-05, %v1127_v60  ;;  %v1128_v63 = vmul.f32 0.125, %v1120_v61 }
 0x7e8   : > { %v1123_v0 = vpop.xlane.xlu0 %1122 }
 0x7e9   : > { %1881 = vrsqrt.f32 %v1132_v62  ;;  %v1133_v1 = vadd.f32 1e-05, %v1128_v63  ;;  %v1129_v2 = vmul.f32 0.125, %v1123_v0 }
 0x7ea   : > { %v1126_v3 = vpop.xlane.xlu1 %1125 }
 0x7eb   : > { %1883 = vrsqrt.f32 %v1133_v1  ;;  %v1134_v4 = vadd.f32 1e-05, %v1129_v2  ;;  %v1130_v5 = vmul.f32 0.125, %v1126_v3 }
 0x7ed   : > { %1885 = vrsqrt.f32 %v1134_v4  ;;  %v1135_v6 = vadd.f32 1e-05, %v1130_v5 }
 0x7ef   : > { %1887 = vrsqrt.f32 %v1135_v6 }
 0x7f3   : > { %v1882_v8 = vpop.eup %1881 }
 0x7f4   : > { %v1146_v9 = vmul.f32 %v1882_v8, %v1609_v7 }
 0x7f5   : > { %v1884_v10 = vpop.eup %1883 }
 0x7f6   : > { %v1147_v11 = vmul.f32 %v1884_v10, %v1609_v7  ;;  %v1150_v12 = vmul.f32 %v1146_v9, %v1107_v40 }
 0x7f7   : > { %v1886_v13 = vpop.eup %1885 }
 0x7f8   : > { %v1148_v15 = vmul.f32 %v1886_v13, %v1609_v7  ;;  %v1151_v16 = vmul.f32 %v1147_v11, %v1108_v43  ;;  %v1161_v20 = vadd.f32 %v1610_v14, %v1150_v12 }
 0x7f9   : > { %v1888_v17 = vpop.eup %1887 }
 0x7fa   : > { %v1152_v18 = vmul.f32 %v1148_v15, %v1109_v47  ;;  %v1149_v19 = vmul.f32 %v1888_v17, %v1609_v7  ;;  %v1162_v21 = vadd.f32 %v1610_v14, %v1151_v16 }
 0x7fc   : > { %v1153_v22 = vmul.f32 %v1149_v19, %v1110_v51  ;;  %v1165_v23 = vpack.c.bf16 %v1162_v21, %v1161_v20  ;;  %v1163_v24 = vadd.f32 %v1610_v14, %v1152_v18 }
 0x7fe   : > { %1660 = vmatprep.mubr.msk.bf16.mxu1 %vm1089_vm2, %v1165_v23  ;;  %v1164_v25 = vadd.f32 %v1610_v14, %v1153_v22 }
 0x800   : > { %v1166_v26 = vpack.c.bf16 %v1164_v25, %v1163_v24 }
 0x802   : > { %1661 = vmatmul.mubr.msk.bf16.vlgmr.msra.gmra.mrb[4].mxu1 %vm1089_vm2, %v1166_v26 }
 0x8d5   : > { %v1662_v29 = vpop.f32.mrb[4].mxu1 }
 0x8d6   : > { %v1228_v30 = vadd.f32 %v1662_v29, %v1611_v28  ;;  %v1219_v31 = vpop.f32.mrb[5].mxu1 }
 0x8d7   : > { %v1220_v32 = vadd.f32 %v1611_v28, %v1219_v31  ;;  %v1663_v33 = vpop.f32.mrb[6].mxu1 }
 0x8d8   : > { %v1616_v34 = vmul.f32 -1.442695, %v1228_v30  ;;  %v1222_v35 = vpop.f32.mrb[7].mxu1  ;;  %v1231_v38 = vadd.f32 %v1663_v33, %v1611_v28  ;;  %v1241_v41 = vsel %vm1234_vm4, %v1228_v30, -inf }
 0x8d9   : > { %v1223_v36 = vadd.f32 %v1611_v28, %v1222_v35  ;;  %v1235_v37 = vsel %vm1234_vm4, %v1220_v32, -inf  ;;  %v1614_v0 = vmul.f32 -1.442695, %v1220_v32 }
 0x8da   : > { %1236 = vmax.xlane.f32.xlu0 %v1235_v37  ;;  %1889 = vpow2.f32 %v1616_v34  ;;  %v1244_v42 = vsel %vm1234_vm4, %v1231_v38, -inf  ;;  %v1617_v61 = vmul.f32 -1.442695, %v1231_v38 }
 0x8db   : > { %v1615_v39 = vmul.f32 -1.442695, %v1223_v36  ;;  %v1238_v40 = vsel %vm1234_vm4, %v1223_v36, -inf }
 0x8dc   : > { %1239 = vmax.xlane.f32.xlu1 %v1238_v40 }
 0x8dd   : > { %1891 = vpow2.f32 %v1615_v39 }
 0x8de   : > { %1242 = vmax.xlane.f32.xlu0 %v1241_v41 }
 0x8e0   : > { %1245 = vmax.xlane.f32.xlu1 %v1244_v42 }
 0x8e4   : > { %v1890_v43 = vpop.eup %1889 }
 0x8e5   : > { %v1293_v46 = vadd.f32 1.0, %v1890_v43 }
 0x8e7   : > { %v1892_v44 = vpop.eup %1891 }
 0x8e8   : > { %v1292_v45 = vadd.f32 1.0, %v1892_v44 }
 0x8ea   : > { %1893 = vrcp.f32 %v1292_v45 }
 0x8eb   : > { %1895 = vrcp.f32 %v1293_v46 }
 0x8f4   : > { %v1894_v47 = vpop.eup %1893 }
 0x8f5   : > { %v1304_v48 = vmul.f32 2.5, %v1894_v47  ;;  %v1896_v49 = vpop.eup %1895 }
 0x8f6   : > { %v1305_v50 = vmul.f32 2.5, %v1896_v49 }
 0x8f7   : > { %1314 = vperm.xlu1 %1860, %v1304_v48  }
 0x8fb   : > { %1319 = vperm.xlu1 %1860, %v1305_v50  }
 0x967   : > { %v1237_v51 = vpop.xlane.xlu0 %1236 }
 0x968   : > { %v1247_v52 = vsub.f32 %v1220_v32, %v1237_v51 }
 0x969   : > { %v1240_v53 = vpop.xlane.xlu1 %1239 }
 0x96a   : > { %v1248_v55 = vsub.f32 %v1223_v36, %v1240_v53  ;;  %v1251_v57 = vmul.f32 1.442695, %v1247_v52 }
 0x96b   : > { %v1243_v54 = vpop.xlane.xlu0 %1242 }
 0x96c   : > { %v1249_v56 = vsub.f32 %v1228_v30, %v1243_v54  ;;  %v1253_v62 = vmul.f32 1.442695, %v1248_v55 }
 0x96d   : > { %v1246_v58 = vpop.xlane.xlu1 %1245 }
 0x96e   : > { %v1255_v59 = vmul.f32 1.442695, %v1249_v56  ;;  %v1250_v60 = vsub.f32 %v1231_v38, %v1246_v58 }
 0x970   : > { %1897 = vpow2.f32 %v1255_v59  ;;  %v1257_v63 = vmul.f32 1.442695, %v1250_v60 }
 0x971   : > { %1899 = vpow2.f32 %v1251_v57 }
 0x972   : > { %1901 = vpow2.f32 %v1257_v63 }
 0x973   : > { %1903 = vpow2.f32 %v1617_v61 }
 0x974   : > { %1905 = vpow2.f32 %v1253_v62 }
 0x975   : > { %1907 = vpow2.f32 %v1614_v0 }
 0x976   : > { %v1315_v17 = vpop.permute.xlu1 %1314 }
 0x97a   : > { %v1898_v1 = vpop.eup %1897  ;;  %v1320_v18 = vpop.permute.xlu1 %1319 }
 0x97b   : > { %v1900_v2 = vpop.eup %1899  ;;  %v1265_v3 = vsel %vm1234_vm4, %v1898_v1, 0.0 }
 0x97c   : > { %v1902_v4 = vpop.eup %1901  ;;  %1266 = vadd.xlane.f32.xlu0 %v1265_v3  ;;  %v1259_v8 = vsel %vm1234_vm4, %v1900_v2, 0.0 }
 0x97d   : > { %v1904_v5 = vpop.eup %1903  ;;  %v1268_v6 = vsel %vm1234_vm4, %v1902_v4, 0.0 }
 0x97e   : > { %v1906_v7 = vpop.eup %1905  ;;  %1269 = vadd.xlane.f32.xlu1 %v1268_v6  ;;  %v1294_v10 = vadd.f32 1.0, %v1904_v5 }
 0x97f   : > { %v1908_v9 = vpop.eup %1907  ;;  %v1262_v11 = vsel %vm1234_vm4, %v1906_v7, 0.0 }
 0x980   : > { %1260 = vadd.xlane.f32.xlu0 %v1259_v8  ;;  %v1291_v12 = vadd.f32 1.0, %v1908_v9  ;;  %1909 = vrcp.f32 %v1294_v10 }
 0x982   : > { %1263 = vadd.xlane.f32.xlu1 %v1262_v11  ;;  %1911 = vrcp.f32 %v1291_v12 }
 0x98a   : > { %v1910_v13 = vpop.eup %1909 }
 0x98b   : > { %v1306_v15 = vmul.f32 2.5, %v1910_v13 }
 0x98c   : > { %v1912_v14 = vpop.eup %1911 }
 0x98d   : > { %v1303_v16 = vmul.f32 2.5, %v1912_v14 }
 0x993   : > { %1324 = vperm.xlu1 %1860, %v1306_v15  }
 0x996   : > { %1309 = vperm.xlu0 %1859, %v1303_v16  }
 0xa09   : > { %v1267_v19 = vpop.xlane.xlu0 %1266 }
 0xa0a   : > { %1913 = vrcp.f32 %v1267_v19 }
 0xa0b   : > { %v1270_v20 = vpop.xlane.xlu1 %1269 }
 0xa0c   : > { %1915 = vrcp.f32 %v1270_v20 }
 0xa0d   : > { %v1261_v21 = vpop.xlane.xlu0 %1260 }
 0xa0e   : > { %1917 = vrcp.f32 %v1261_v21 }
 0xa0f   : > { %v1264_v22 = vpop.xlane.xlu1 %1263 }
 0xa10   : > { %1919 = vrcp.f32 %v1264_v22 }
 0xa13   : > { %v1325_v29 = vpop.permute.xlu1 %1324 }
 0xa14   : > { %v1914_v23 = vpop.eup %1913 }
 0xa15   : > { %v1276_v24 = vmul.f32 %v1914_v23, %v1898_v1  ;;  %v1310_v33 = vpop.permute.xlu0 %1309 }
 0xa16   : > { %v1916_v25 = vpop.eup %1915 }
 0xa17   : > { %v1329_v26 = vmul.f32 %v1320_v18, %v1276_v24  ;;  %v1278_v27 = vmul.f32 %v1916_v25, %v1902_v4 }
 0xa18   : > { %v1918_v28 = vpop.eup %1917 }
 0xa19   : > { %v1330_v30 = vmul.f32 %v1325_v29, %v1278_v27  ;;  %1333 = vst.msk [vmem:[%s693_s2 + $0x10] sm:$0xff] %vm1234_vm4, %v1329_v26  ;;  %v1272_v31 = vmul.f32 %v1918_v28, %v1900_v2 }
 0xa1a   : > { %v1920_v32 = vpop.eup %1919 }
 0xa1b   : > { %v1274_v34 = vmul.f32 %v1920_v32, %v1906_v7  ;;  %1334 = vst.msk [vmem:[%s693_s2 + $0x18] sm:$0xff] %vm1234_vm4, %v1330_v30  ;;  %v1327_v35 = vmul.f32 %v1310_v33, %v1272_v31 }
 0xa1d   : > { %v1328_v36 = vmul.f32 %v1315_v17, %v1274_v34  ;;  %1331 = vst.msk [vmem:[%s693_s2] sm:$0xff] %vm1234_vm4, %v1327_v35 }
 0xa1f   : > { %1332 = vst.msk [vmem:[%s693_s2 + $0x8] sm:$0xff] %vm1234_vm4, %v1328_v36 }
 0xa20   : > { %2356 = shalt.err (!%p2353_p9)
}
 0xa21   : > { %s2357_s2 = scalar_lea.hbm %s3039_s23, 512  ;;  %s2361_s18 = scalar_lea.hbm %s3156_s17, 1024 }
 0xa22   : > { %p2358_p12 = scmp.ne.s32.totalorder %s3039_s23, %s2357_s2  ;;  %p2362_p3 = scmp.lt.u32.totalorder %s3039_s23, %s3156_s17 }
 0xa23   : > { %p2363_p2 = scmp.lt.u32.totalorder %s2361_s18, %s2357_s2  ;;  %p2365_p4 = scmp.lt.u32.totalorder %s2357_s2, %s3039_s23 }
 0xa24   : > { %p2359_p13 = pnand %p2358_p12, %p3157_p10 }
 0xa25   : > { %p2364_p8 = por %p2363_p2, %p2362_p3 }
 0xa26   : > { %p2360_p1 = pneg %p2359_p13 }
 0xa27   : > { %p2366_p11 = por %p2365_p4, %p2364_p8 }
 0xa29   : > { %p2367_p0 = pnand %p2366_p11, %p2360_p1 }
 0xa2b   : > { %2370 = shalt.err (!%p2367_p0)
}
 0xa2c   : > { %s2460_s15 = smov 128   ;;  %s2461_s19 = smov 8  }
 0xa2d   : > { %1723 = dma.vmem_to_hbm [thread:$0]  (%p3157_p10), %s3034_s27, 512, %s3039_s23, %s1336_s20, %s2460_s15, %s2460_s15, %s2461_s19  }
 0xa2e PF: > { %s3158_s16 = sld [smem:[#allocation36_spill]]  ;;  %p3159_p5 = scmp.ne.s32.totalorder %s3134_s30, 0 }
 0xa2f   : > { %p3160_p7 = scmp.ge.s32.totalorder %s2437_s21, 2 }
 0xa31   : > { %p1773_p6 = pnand %p3160_p7, %p3159_p5 }
 0xa34   : > { %s1364_s22 = sand.u32 1, %s3158_s16  }
 0xa35   : > { %s1365_s2 = scalar_lea.sflag [#allocation4], %s1364_s22 }
 0xa36   : > { %2420 = dma.done.wait (!%p1773_p6), %s1365_s2, 512  }
 0xa37   : > { %2422 = vsyncadd (!%p1773_p6), %s1365_s2, 4294966784  ;;  %s3161_s18 = sld [smem:[#allocation37_spill]]  ;;  %s3162_s19 = sld [smem:[#allocation38_spill]] }
 0xa38   : > { %p35_p9 = scmp.ge.s32.totalorder %s2872_s28, 4   ;;  %s3163_s20 = smov %s2883_s24 }
 0xa39   : > { %s3164_s21 = smov %s2872_s28 }
 0xa3a   :  { %37 = sbr.rel (!%p35_p9) target bundleno = 17 (0x11), region = 181 }
 0xa41   :  { %1370 = vsyncpa [#allocation3], 1 }
 0xa42   :  { %1372 = vsyncpa [#allocation3 + $0x1], 1 }
 0xa43   :  { %1373 = vsyncpa [#allocation6], 1 }
 0xa44   :  { %1374 = vsyncpa [#allocation9], 1 }
 0xa45   :  { %1375 = vsyncpa [#allocation12], 1 }
 0xa46   :  { %1376 = vsyncpa [#allocation15], 1 }
 0xa47   :  { %1377 = vsyncpa [#allocation18], 1 }
 0xa48   :  { %1378 = vsyncpa [#allocation21], 1 }
 0xa49   :  { %1379 = vsyncpa [#allocation24], 1 }
 0xa4a   :  { %1380 = vsyncpa [#allocation4], 1 }
 0xa4b   :  { %1382 = vsyncpa [#allocation4 + $0x1], 1 }

</bundles_post_ra>
